<compile_context>
chip_gen: v7x
topology: tpu7x:2x2x1
jax: 0.10.0
libtpu: 0.0.40
codegen_flags: <defaults>
</compile_context>

<pallas_src>
import functools

import jax
import jax.numpy as jnp
from jax import lax
from jax.experimental import pallas as pl
from jax.experimental.pallas import tpu as pltpu


def _tracknet_kernel(gi0_ref, len_ref, whh0_ref, bhh0n_ref, w1_ref, b1_ref,
                     whead_ref, bhead_ref, out_ref, h0_scr, h1_scr, h1all_scr):
    T, BT, H = h1all_scr.shape
    H2 = 2 * H
    K = out_ref.shape[-1]

    # Hoist all weight / bias loads out of the recurrence.
    whh0 = whh0_ref[...]          # (H, 3H)  layer-0 recurrent weights
    bhh0_n = bhh0n_ref[...]       # (1, H)   layer-0 n-gate recurrent bias
    w1 = w1_ref[...]              # (2H, 4H) fused layer-1 weights
    b1 = b1_ref[...]              # (1, 4H)  fused layer-1 biases
    mm = whh0.dtype               # matmul operand dtype (f32 or bf16)

    h0_scr[...] = jnp.zeros_like(h0_scr)
    h1_scr[...] = jnp.zeros_like(h1_scr)

    def step(t, carry):
        h0 = h0_scr[...]
        h1 = h1_scr[...]

        # ---- GRU layer 0: input projection gi0 precomputed in the wrapper,
        #      r/z biases pre-folded into gi0; one matmul on the serial chain.
        gi0 = gi0_ref[t]                                           # (BT, 3H) f32
        gh0 = jnp.dot(h0.astype(mm), whh0,
                      preferred_element_type=jnp.float32)          # (BT, 3H)
        rz0 = jax.nn.sigmoid(gi0[:, :H2] + gh0[:, :H2])
        r0, z0 = rz0[:, :H], rz0[:, H:]
        n0 = jnp.tanh(gi0[:, H2:] + r0 * (gh0[:, H2:] + bhh0_n))
        h0n = (1.0 - z0) * n0 + z0 * h0
        h0_scr[...] = h0n

        # ---- GRU layer 1: single fused matmul -> [r,z (gi+gh) | n_gi | n_gh].
        hcat = jnp.concatenate([h0n.astype(mm), h1.astype(mm)], axis=1)   # (BT, 2H)
        g1 = jnp.dot(hcat, w1, preferred_element_type=jnp.float32) + b1   # (BT, 4H)
        rz1 = jax.nn.sigmoid(g1[:, :H2])
        r1, z1 = rz1[:, :H], rz1[:, H:]
        n1 = jnp.tanh(g1[:, H2:3 * H] + r1 * g1[:, 3 * H:])
        h1n = (1.0 - z1) * n1 + z1 * h1
        h1_scr[...] = h1n
        h1all_scr[t] = h1n
        return carry

    lax.fori_loop(0, T, step, 0, unroll=True)

    # ---- Off-critical-path epilogue: length mask (pack/pad_packed semantics)
    #      + all four heads fused into one batched matmul, emitted as a single
    #      fused lane slab (coords_t1 | radius_t1 | coords_t2 | radius_t2).
    lengths = len_ref[...]                                          # (BT, 1) int32
    t_iota = lax.broadcasted_iota(jnp.int32, (T, BT, H), 0)
    mask = t_iota < lengths[None, :, :]
    o = jnp.where(mask, h1all_scr[...], 0.0)                        # (T, BT, H)
    ho = jnp.dot(o.reshape(T * BT, H).astype(mm), whead_ref[...],
                 preferred_element_type=jnp.float32) + bhead_ref[...]
    out_ref[...] = ho.reshape(T, BT, K)


@functools.partial(jax.jit, static_argnames=("output_features", "matmul_dtype"))
def step_ahead_tracknet(x, input_lengths, params, output_features=3,
                        matmul_dtype=jnp.float32):
    """x: (B, T, F) batch_first; input_lengths: (B,) int. Returns dict of arrays."""
    B, T, _ = x.shape
    H = params["whh0"].shape[0]
    OUT = output_features
    K = 2 * OUT + 2

    BT = 8                                   # batch tile = one f32 sublane group
    Bp = ((B + BT - 1) // BT) * BT           # pad batch to a multiple of 8

    f32 = jnp.float32
    x_tm = jnp.transpose(x, (1, 0, 2)).astype(f32)                  # (T, B, F)
    x_tm = jnp.pad(x_tm, ((0, 0), (0, Bp - B), (0, 0)))
    lengths = jnp.pad(input_lengths.astype(jnp.int32), (0, Bp - B)).reshape(Bp, 1)

    # ---- trace-time weight prep (fused / pre-biased layouts) ----
    wih0, whh0 = params["wih0"].astype(f32), params["whh0"].astype(f32)
    bih0, bhh0 = params["bih0"].astype(f32), params["bhh0"].astype(f32)
    wih1, whh1 = params["wih1"].astype(f32), params["whh1"].astype(f32)
    bih1, bhh1 = params["bih1"].astype(f32), params["bhh1"].astype(f32)
    whead, bhead = params["w_head"].astype(f32), params["b_head"].astype(f32)

    # Layer 0: hoist input projection + biases (bih0 everywhere, plus bhh0 for
    # the r/z gates, which are always summed) out of the recurrence.
    bias0 = jnp.concatenate(
        [bih0[:, :2 * H] + bhh0[:, :2 * H], bih0[:, 2 * H:]], axis=1)        # (1, 3H)
    gi0 = jnp.einsum("tbf,fg->tbg", x_tm, wih0,
                     precision=jax.lax.Precision.HIGHEST) + bias0            # (T, Bp, 3H)
    bhh0_n = bhh0[:, 2 * H:]                                                 # (1, H)

    # Layer 1: fuse the per-step gi/gh matmuls into one (2H, 4H) matmul whose
    # output columns are [ r,z: gi+gh summed | n: gi | n: gh ].
    zH = jnp.zeros((H, H), f32)
    w1 = jnp.concatenate([
        jnp.concatenate([wih1[:, :2 * H], whh1[:, :2 * H]], axis=0),         # (2H, 2H)
        jnp.concatenate([wih1[:, 2 * H:], zH], axis=0),                      # (2H, H)
        jnp.concatenate([zH, whh1[:, 2 * H:]], axis=0),                      # (2H, H)
    ], axis=1)                                                               # (2H, 4H)
    b1 = jnp.concatenate([bih1[:, :2 * H] + bhh1[:, :2 * H],
                          bih1[:, 2 * H:], bhh1[:, 2 * H:]], axis=1)         # (1, 4H)

    # Optional bf16 MXU operands (v6e/v7x); biases & gate math stay f32.
    whh0_k = whh0.astype(matmul_dtype)
    w1_k = w1.astype(matmul_dtype)
    whead_k = whead.astype(matmul_dtype)

    grid = (Bp // BT,)
    out = pl.pallas_call(
        _tracknet_kernel,
        out_shape=jax.ShapeDtypeStruct((T, Bp, K), f32),
        grid_spec=pltpu.PrefetchScalarGridSpec(
            num_scalar_prefetch=0,
            grid=grid,
            in_specs=[
                pl.BlockSpec((T, BT, 3 * H), lambda b: (0, b, 0)),   # gi0
                pl.BlockSpec((BT, 1), lambda b: (b, 0)),             # lengths
                pl.BlockSpec((H, 3 * H), lambda b: (0, 0)),          # whh0
                pl.BlockSpec((1, H), lambda b: (0, 0)),              # bhh0_n
                pl.BlockSpec((2 * H, 4 * H), lambda b: (0, 0)),      # w1 fused
                pl.BlockSpec((1, 4 * H), lambda b: (0, 0)),          # b1 fused
                pl.BlockSpec((H, K), lambda b: (0, 0)),              # w_head fused
                pl.BlockSpec((1, K), lambda b: (0, 0)),              # b_head fused
            ],
            out_specs=pl.BlockSpec((T, BT, K), lambda b: (0, b, 0)),
            scratch_shapes=[pltpu.VMEM((BT, H), f32),                # h0
                            pltpu.VMEM((BT, H), f32),                # h1
                            pltpu.VMEM((T, BT, H), f32)],            # all h1[t]
        ),
        compiler_params=pltpu.CompilerParams(
            dimension_semantics=("parallel",)),                      # v7x: 2 TCs
    )(gi0, lengths, whh0_k, bhh0_n, w1_k, b1, whead_k, bhead)

    ho = jnp.transpose(out[:, :B, :], (1, 0, 2))                     # (B, T, K)
    sp = jax.nn.softplus
    return dict(coords_t1=ho[..., :OUT],
                radius_t1=sp(ho[..., OUT:OUT + 1]),
                coords_t2=ho[..., OUT + 1:2 * OUT + 1],
                radius_t2=sp(ho[..., 2 * OUT + 1:2 * OUT + 2]))


def init_params(key, input_features=3, hidden_features=32, output_features=3):
    """Deterministic init mimicking PyTorch's U(-1/sqrt(H), 1/sqrt(H)).
    Weights are stored pre-transposed (in_dim, out_dim); gate order (r, z, n)."""
    H = hidden_features
    bound = 1.0 / float(jnp.sqrt(jnp.float32(H)))
    keys = jax.random.split(key, 16)
    u = lambda kk, shape: jax.random.uniform(kk, shape, jnp.float32, -bound, bound)

    p = dict(
        wih0=u(keys[0], (input_features, 3 * H)),
        whh0=u(keys[1], (H, 3 * H)),
        bih0=u(keys[2], (1, 3 * H)),
        bhh0=u(keys[3], (1, 3 * H)),
        wih1=u(keys[4], (H, 3 * H)),
        whh1=u(keys[5], (H, 3 * H)),
        bih1=u(keys[6], (1, 3 * H)),
        bhh1=u(keys[7], (1, 3 * H)),
    )
    wc1, bc1 = u(keys[8], (H, output_features)), u(keys[9], (1, output_features))
    wr1, br1 = u(keys[10], (H, 1)), u(keys[11], (1, 1))
    wc2, bc2 = u(keys[12], (H, output_features)), u(keys[13], (1, output_features))
    wr2, br2 = u(keys[14], (H, 1)), u(keys[15], (1, 1))
    p["w_head"] = jnp.concatenate([wc1, wr1, wc2, wr2], axis=1)   # (H, 2*OUT+2)
    p["b_head"] = jnp.concatenate([bc1, br1, bc2, br2], axis=1)   # (1, 2*OUT+2)
    return p


def reference(x, input_lengths, p, output_features=3):
    """Pure-JAX reference of the same math (for correctness check)."""
    B, T, _ = x.shape
    H = p["whh0"].shape[0]
    OUT = output_features
    hp = jax.lax.Precision.HIGHEST

    def gru_cell(x_t, h, wih, whh, bih, bhh):
        gi = jnp.dot(x_t, wih, precision=hp) + bih
        gh = jnp.dot(h, whh, precision=hp) + bhh
        r = jax.nn.sigmoid(gi[:, :H] + gh[:, :H])
        z = jax.nn.sigmoid(gi[:, H:2 * H] + gh[:, H:2 * H])
        n = jnp.tanh(gi[:, 2 * H:] + r * gh[:, 2 * H:])
        return (1.0 - z) * n + z * h

    h0 = jnp.zeros((B, H), jnp.float32)
    h1 = jnp.zeros((B, H), jnp.float32)
    outs = []
    for t in range(T):
        h0 = gru_cell(x[:, t], h0, p["wih0"], p["whh0"], p["bih0"], p["bhh0"])
        h1 = gru_cell(h0, h1, p["wih1"], p["whh1"], p["bih1"], p["bhh1"])
        mask = (t < input_lengths).astype(jnp.float32)[:, None]
        outs.append(jnp.dot(h1 * mask, p["w_head"], precision=hp) + p["b_head"])
    ho = jnp.stack(outs, axis=1)   # (B, T, 2*OUT+2)
    sp = jax.nn.softplus
    return dict(coords_t1=ho[..., :OUT],
                radius_t1=sp(ho[..., OUT:OUT + 1]),
                coords_t2=ho[..., OUT + 1:2 * OUT + 1],
                radius_t2=sp(ho[..., 2 * OUT + 1:2 * OUT + 2]))


if __name__ == "__main__":
    key = jax.random.PRNGKey(0)
    kp, kx = jax.random.split(key)

    B, T, F, H, OUT = 2, 8, 3, 32, 3
    params = init_params(kp, input_features=F, hidden_features=H, output_features=OUT)
    x = jax.random.normal(kx, (B, T, F), jnp.float32)
    # max(lengths) == T, matching pad_packed_sequence's output length.
    input_lengths = jnp.array([8, 5], dtype=jnp.int32)

    out = step_ahead_tracknet(x, input_lengths, params, output_features=OUT)
    out = jax.block_until_ready(out)

    ref = reference(x, input_lengths, params, output_features=OUT)
    for name in ("coords_t1", "radius_t1", "coords_t2", "radius_t2"):
        assert out[name].shape == ref[name].shape, name
        assert jnp.allclose(out[name], ref[name], atol=1e-3, rtol=1e-3), name

    print("KERNEL_OK")
</pallas_src>

<mosaic_0001>
module attributes {stable_mosaic.version = 11 : i64} {
  func.func @_tracknet_kernel(%arg0: i32, %arg1: memref<8x8x96xf32, #tpu.memory_space<vmem>>, %arg2: memref<8x1xi32, #tpu.memory_space<vmem>>, %arg3: memref<32x96xf32, #tpu.memory_space<vmem>>, %arg4: memref<1x32xf32, #tpu.memory_space<vmem>>, %arg5: memref<64x128xf32, #tpu.memory_space<vmem>>, %arg6: memref<1x128xf32, #tpu.memory_space<vmem>>, %arg7: memref<32x8xf32, #tpu.memory_space<vmem>>, %arg8: memref<1x8xf32, #tpu.memory_space<vmem>>, %arg9: memref<8x8x8xf32, #tpu.memory_space<vmem>>, %arg10: memref<8x32xf32, #tpu.memory_space<vmem>>, %arg11: memref<8x32xf32, #tpu.memory_space<vmem>>, %arg12: memref<8x8x32xf32, #tpu.memory_space<vmem>>) attributes {dimension_semantics = [#tpu.dimension_semantics<parallel>], iteration_bounds = array<i64: 1>, scalar_prefetch = 0 : i64, scratch_operands = 3 : i64, tpu.core_type = #tpu.core_type<tc>, window_params = [{transform_indices = @transform_0, window_bounds = array<i64: 8, 8, 96>}, {transform_indices = @transform_1, window_bounds = array<i64: 8, 1>}, {pipeline_mode = #tpu.pipeline_mode<synchronous>, transform_indices = @transform_2, window_bounds = array<i64: 32, 96>}, {pipeline_mode = #tpu.pipeline_mode<synchronous>, transform_indices = @transform_3, window_bounds = array<i64: 1, 32>}, {pipeline_mode = #tpu.pipeline_mode<synchronous>, transform_indices = @transform_4, window_bounds = array<i64: 64, 128>}, {pipeline_mode = #tpu.pipeline_mode<synchronous>, transform_indices = @transform_5, window_bounds = array<i64: 1, 128>}, {pipeline_mode = #tpu.pipeline_mode<synchronous>, transform_indices = @transform_6, window_bounds = array<i64: 32, 8>}, {pipeline_mode = #tpu.pipeline_mode<synchronous>, transform_indices = @transform_7, window_bounds = array<i64: 1, 8>}, {transform_indices = @transform_8, window_bounds = array<i64: 8, 8, 8>}]} {
    %c0 = arith.constant 0 : index
    %c0_0 = arith.constant 0 : index
    %0 = vector.load %arg3[%c0, %c0_0] : memref<32x96xf32, #tpu.memory_space<vmem>>, vector<32x96xf32>
    %c0_1 = arith.constant 0 : index
    %c0_2 = arith.constant 0 : index
    %1 = vector.load %arg4[%c0_1, %c0_2] : memref<1x32xf32, #tpu.memory_space<vmem>>, vector<1x32xf32>
    %c0_3 = arith.constant 0 : index
    %c0_4 = arith.constant 0 : index
    %2 = vector.load %arg5[%c0_3, %c0_4] : memref<64x128xf32, #tpu.memory_space<vmem>>, vector<64x128xf32>
    %c0_5 = arith.constant 0 : index
    %c0_6 = arith.constant 0 : index
    %3 = vector.load %arg6[%c0_5, %c0_6] : memref<1x128xf32, #tpu.memory_space<vmem>>, vector<1x128xf32>
    %cst = arith.constant 0.000000e+00 : f32
    %4 = vector.broadcast %cst : f32 to vector<8x32xf32>
    %c0_7 = arith.constant 0 : index
    %c0_8 = arith.constant 0 : index
    %5 = vector.load %arg10[%c0_7, %c0_8] : memref<8x32xf32, #tpu.memory_space<vmem>>, vector<8x32xf32>
    tpu.vector_store %arg10[%c0_7, %c0_8], %4 {strides = array<i32>} : memref<8x32xf32, #tpu.memory_space<vmem>>, vector<8x32xf32>,
    %cst_9 = arith.constant 0.000000e+00 : f32
    %6 = vector.broadcast %cst_9 : f32 to vector<8x32xf32>
    %c0_10 = arith.constant 0 : index
    %c0_11 = arith.constant 0 : index
    %7 = vector.load %arg11[%c0_10, %c0_11] : memref<8x32xf32, #tpu.memory_space<vmem>>, vector<8x32xf32>
    tpu.vector_store %arg11[%c0_10, %c0_11], %6 {strides = array<i32>} : memref<8x32xf32, #tpu.memory_space<vmem>>, vector<8x32xf32>,
    %c0_i32 = arith.constant 0 : i32
    %c0_12 = arith.constant 0 : index
    %c0_13 = arith.constant 0 : index
    %8 = vector.load %arg10[%c0_12, %c0_13] : memref<8x32xf32, #tpu.memory_space<vmem>>, vector<8x32xf32>
    %c0_14 = arith.constant 0 : index
    %c0_15 = arith.constant 0 : index
    %9 = vector.load %arg11[%c0_14, %c0_15] : memref<8x32xf32, #tpu.memory_space<vmem>>, vector<8x32xf32>
    %10 = arith.index_cast %c0_i32 : i32 to index
    %c0_16 = arith.constant 0 : index
    %c0_17 = arith.constant 0 : index
    %11 = vector.load %arg1[%10, %c0_16, %c0_17] : memref<8x8x96xf32, #tpu.memory_space<vmem>>, vector<1x8x96xf32>
    %12 = vector.shape_cast %11 : vector<1x8x96xf32> to vector<8x96xf32>
    %cst_18 = arith.constant dense<0.000000e+00> : vector<8x96xf32>
    %13 = tpu.matmul %8, %0, %cst_18 {dimension_numbers = #tpu.dot_dimension_numbers<[1], [0], [0], [1], [0, 0, 1, 1], [], []>} : vector<8x32xf32>, vector<32x96xf32>, vector<8x96xf32> -> vector<8x96xf32>
    %14 = vector.extract_strided_slice %12 {offsets = [0, 0], sizes = [8, 64], strides = [1, 1]} : vector<8x96xf32> to vector<8x64xf32>
    %15 = vector.extract_strided_slice %13 {offsets = [0, 0], sizes = [8, 64], strides = [1, 1]} : vector<8x96xf32> to vector<8x64xf32>
    %16 = arith.addf %14, %15 : vector<8x64xf32>
    %17 = arith.negf %16 : vector<8x64xf32>
    %18 = math.exp %17 : vector<8x64xf32>
    %cst_19 = arith.constant 1.000000e+00 : f32
    %19 = vector.broadcast %cst_19 : f32 to vector<8x64xf32>
    %20 = arith.addf %19, %18 : vector<8x64xf32>
    %21 = arith.divf %19, %20 : vector<8x64xf32>
    %22 = vector.extract_strided_slice %21 {offsets = [0, 0], sizes = [8, 32], strides = [1, 1]} : vector<8x64xf32> to vector<8x32xf32>
    %23 = vector.extract_strided_slice %21 {offsets = [0, 32], sizes = [8, 32], strides = [1, 1]} : vector<8x64xf32> to vector<8x32xf32>
    %24 = vector.extract_strided_slice %12 {offsets = [0, 64], sizes = [8, 32], strides = [1, 1]} : vector<8x96xf32> to vector<8x32xf32>
    %25 = vector.extract_strided_slice %13 {offsets = [0, 64], sizes = [8, 32], strides = [1, 1]} : vector<8x96xf32> to vector<8x32xf32>
    %26 = vector.broadcast %1 : vector<1x32xf32> to vector<8x32xf32>
    %27 = arith.addf %25, %26 : vector<8x32xf32>
    %28 = arith.mulf %22, %27 : vector<8x32xf32>
    %29 = arith.addf %24, %28 : vector<8x32xf32>
    %30 = math.tanh %29 : vector<8x32xf32>
    %cst_20 = arith.constant 1.000000e+00 : f32
    %31 = vector.broadcast %cst_20 : f32 to vector<8x32xf32>
    %32 = arith.subf %31, %23 : vector<8x32xf32>
    %33 = arith.mulf %32, %30 : vector<8x32xf32>
    %34 = arith.mulf %23, %8 : vector<8x32xf32>
    %35 = arith.addf %33, %34 : vector<8x32xf32>
    %c0_21 = arith.constant 0 : index
    %c0_22 = arith.constant 0 : index
    %36 = vector.load %arg10[%c0_21, %c0_22] : memref<8x32xf32, #tpu.memory_space<vmem>>, vector<8x32xf32>
    tpu.vector_store %arg10[%c0_21, %c0_22], %35 {strides = array<i32>} : memref<8x32xf32, #tpu.memory_space<vmem>>, vector<8x32xf32>,
    %37 = tpu.concatenate %35, %9 in 1 : vector<8x32xf32>, vector<8x32xf32> -> vector<8x64xf32>
    %cst_23 = arith.constant dense<0.000000e+00> : vector<8x128xf32>
    %38 = tpu.matmul %37, %2, %cst_23 {dimension_numbers = #tpu.dot_dimension_numbers<[1], [0], [0], [1], [0, 0, 1, 1], [], []>} : vector<8x64xf32>, vector<64x128xf32>, vector<8x128xf32> -> vector<8x128xf32>
    %39 = vector.broadcast %3 : vector<1x128xf32> to vector<8x128xf32>
    %40 = arith.addf %38, %39 : vector<8x128xf32>
    %41 = vector.extract_strided_slice %40 {offsets = [0, 0], sizes = [8, 64], strides = [1, 1]} : vector<8x128xf32> to vector<8x64xf32>
    %42 = arith.negf %41 : vector<8x64xf32>
    %43 = math.exp %42 : vector<8x64xf32>
    %cst_24 = arith.constant 1.000000e+00 : f32
    %44 = vector.broadcast %cst_24 : f32 to vector<8x64xf32>
    %45 = arith.addf %44, %43 : vector<8x64xf32>
    %46 = arith.divf %44, %45 : vector<8x64xf32>
    %47 = vector.extract_strided_slice %46 {offsets = [0, 0], sizes = [8, 32], strides = [1, 1]} : vector<8x64xf32> to vector<8x32xf32>
    %48 = vector.extract_strided_slice %46 {offsets = [0, 32], sizes = [8, 32], strides = [1, 1]} : vector<8x64xf32> to vector<8x32xf32>
    %49 = vector.extract_strided_slice %40 {offsets = [0, 64], sizes = [8, 32], strides = [1, 1]} : vector<8x128xf32> to vector<8x32xf32>
    %50 = vector.extract_strided_slice %40 {offsets = [0, 96], sizes = [8, 32], strides = [1, 1]} : vector<8x128xf32> to vector<8x32xf32>
    %51 = arith.mulf %47, %50 : vector<8x32xf32>
    %52 = arith.addf %49, %51 : vector<8x32xf32>
    %53 = math.tanh %52 : vector<8x32xf32>
    %cst_25 = arith.constant 1.000000e+00 : f32
    %54 = vector.broadcast %cst_25 : f32 to vector<8x32xf32>
    %55 = arith.subf %54, %48 : vector<8x32xf32>
    %56 = arith.mulf %55, %53 : vector<8x32xf32>
    %57 = arith.mulf %48, %9 : vector<8x32xf32>
    %58 = arith.addf %56, %57 : vector<8x32xf32>
    %c0_26 = arith.constant 0 : index
    %c0_27 = arith.constant 0 : index
    %59 = vector.load %arg11[%c0_26, %c0_27] : memref<8x32xf32, #tpu.memory_space<vmem>>, vector<8x32xf32>
    tpu.vector_store %arg11[%c0_26, %c0_27], %58 {strides = array<i32>} : memref<8x32xf32, #tpu.memory_space<vmem>>, vector<8x32xf32>,
    %60 = arith.index_cast %c0_i32 : i32 to index
    %c0_28 = arith.constant 0 : index
    %c0_29 = arith.constant 0 : index
    %61 = vector.load %arg12[%60, %c0_28, %c0_29] : memref<8x8x32xf32, #tpu.memory_space<vmem>>, vector<1x8x32xf32>
    %62 = vector.shape_cast %61 : vector<1x8x32xf32> to vector<8x32xf32>
    %63 = vector.shape_cast %58 : vector<8x32xf32> to vector<1x8x32xf32>
    tpu.vector_store %arg12[%60, %c0_28, %c0_29], %63 {strides = array<i32>} : memref<8x8x32xf32, #tpu.memory_space<vmem>>, vector<1x8x32xf32>,
    %c1_i32 = arith.constant 1 : i32
    %c0_30 = arith.constant 0 : index
    %c0_31 = arith.constant 0 : index
    %64 = vector.load %arg10[%c0_30, %c0_31] : memref<8x32xf32, #tpu.memory_space<vmem>>, vector<8x32xf32>
    %c0_32 = arith.constant 0 : index
    %c0_33 = arith.constant 0 : index
    %65 = vector.load %arg11[%c0_32, %c0_33] : memref<8x32xf32, #tpu.memory_space<vmem>>, vector<8x32xf32>
    %66 = arith.index_cast %c1_i32 : i32 to index
    %c0_34 = arith.constant 0 : index
    %c0_35 = arith.constant 0 : index
    %67 = vector.load %arg1[%66, %c0_34, %c0_35] : memref<8x8x96xf32, #tpu.memory_space<vmem>>, vector<1x8x96xf32>
    %68 = vector.shape_cast %67 : vector<1x8x96xf32> to vector<8x96xf32>
    %cst_36 = arith.constant dense<0.000000e+00> : vector<8x96xf32>
    %69 = tpu.matmul %64, %0, %cst_36 {dimension_numbers = #tpu.dot_dimension_numbers<[1], [0], [0], [1], [0, 0, 1, 1], [], []>} : vector<8x32xf32>, vector<32x96xf32>, vector<8x96xf32> -> vector<8x96xf32>
    %70 = vector.extract_strided_slice %68 {offsets = [0, 0], sizes = [8, 64], strides = [1, 1]} : vector<8x96xf32> to vector<8x64xf32>
    %71 = vector.extract_strided_slice %69 {offsets = [0, 0], sizes = [8, 64], strides = [1, 1]} : vector<8x96xf32> to vector<8x64xf32>
    %72 = arith.addf %70, %71 : vector<8x64xf32>
    %73 = arith.negf %72 : vector<8x64xf32>
    %74 = math.exp %73 : vector<8x64xf32>
    %cst_37 = arith.constant 1.000000e+00 : f32
    %75 = vector.broadcast %cst_37 : f32 to vector<8x64xf32>
    %76 = arith.addf %75, %74 : vector<8x64xf32>
    %77 = arith.divf %75, %76 : vector<8x64xf32>
    %78 = vector.extract_strided_slice %77 {offsets = [0, 0], sizes = [8, 32], strides = [1, 1]} : vector<8x64xf32> to vector<8x32xf32>
    %79 = vector.extract_strided_slice %77 {offsets = [0, 32], sizes = [8, 32], strides = [1, 1]} : vector<8x64xf32> to vector<8x32xf32>
    %80 = vector.extract_strided_slice %68 {offsets = [0, 64], sizes = [8, 32], strides = [1, 1]} : vector<8x96xf32> to vector<8x32xf32>
    %81 = vector.extract_strided_slice %69 {offsets = [0, 64], sizes = [8, 32], strides = [1, 1]} : vector<8x96xf32> to vector<8x32xf32>
    %82 = vector.broadcast %1 : vector<1x32xf32> to vector<8x32xf32>
    %83 = arith.addf %81, %82 : vector<8x32xf32>
    %84 = arith.mulf %78, %83 : vector<8x32xf32>
    %85 = arith.addf %80, %84 : vector<8x32xf32>
    %86 = math.tanh %85 : vector<8x32xf32>
    %cst_38 = arith.constant 1.000000e+00 : f32
    %87 = vector.broadcast %cst_38 : f32 to vector<8x32xf32>
    %88 = arith.subf %87, %79 : vector<8x32xf32>
    %89 = arith.mulf %88, %86 : vector<8x32xf32>
    %90 = arith.mulf %79, %64 : vector<8x32xf32>
    %91 = arith.addf %89, %90 : vector<8x32xf32>
    %c0_39 = arith.constant 0 : index
    %c0_40 = arith.constant 0 : index
    %92 = vector.load %arg10[%c0_39, %c0_40] : memref<8x32xf32, #tpu.memory_space<vmem>>, vector<8x32xf32>
    tpu.vector_store %arg10[%c0_39, %c0_40], %91 {strides = array<i32>} : memref<8x32xf32, #tpu.memory_space<vmem>>, vector<8x32xf32>,
    %93 = tpu.concatenate %91, %65 in 1 : vector<8x32xf32>, vector<8x32xf32> -> vector<8x64xf32>
    %cst_41 = arith.constant dense<0.000000e+00> : vector<8x128xf32>
    %94 = tpu.matmul %93, %2, %cst_41 {dimension_numbers = #tpu.dot_dimension_numbers<[1], [0], [0], [1], [0, 0, 1, 1], [], []>} : vector<8x64xf32>, vector<64x128xf32>, vector<8x128xf32> -> vector<8x128xf32>
    %95 = vector.broadcast %3 : vector<1x128xf32> to vector<8x128xf32>
    %96 = arith.addf %94, %95 : vector<8x128xf32>
    %97 = vector.extract_strided_slice %96 {offsets = [0, 0], sizes = [8, 64], strides = [1, 1]} : vector<8x128xf32> to vector<8x64xf32>
    %98 = arith.negf %97 : vector<8x64xf32>
    %99 = math.exp %98 : vector<8x64xf32>
    %cst_42 = arith.constant 1.000000e+00 : f32
    %100 = vector.broadcast %cst_42 : f32 to vector<8x64xf32>
    %101 = arith.addf %100, %99 : vector<8x64xf32>
    %102 = arith.divf %100, %101 : vector<8x64xf32>
    %103 = vector.extract_strided_slice %102 {offsets = [0, 0], sizes = [8, 32], strides = [1, 1]} : vector<8x64xf32> to vector<8x32xf32>
    %104 = vector.extract_strided_slice %102 {offsets = [0, 32], sizes = [8, 32], strides = [1, 1]} : vector<8x64xf32> to vector<8x32xf32>
    %105 = vector.extract_strided_slice %96 {offsets = [0, 64], sizes = [8, 32], strides = [1, 1]} : vector<8x128xf32> to vector<8x32xf32>
    %106 = vector.extract_strided_slice %96 {offsets = [0, 96], sizes = [8, 32], strides = [1, 1]} : vector<8x128xf32> to vector<8x32xf32>
    %107 = arith.mulf %103, %106 : vector<8x32xf32>
    %108 = arith.addf %105, %107 : vector<8x32xf32>
    %109 = math.tanh %108 : vector<8x32xf32>
    %cst_43 = arith.constant 1.000000e+00 : f32
    %110 = vector.broadcast %cst_43 : f32 to vector<8x32xf32>
    %111 = arith.subf %110, %104 : vector<8x32xf32>
    %112 = arith.mulf %111, %109 : vector<8x32xf32>
    %113 = arith.mulf %104, %65 : vector<8x32xf32>
    %114 = arith.addf %112, %113 : vector<8x32xf32>
    %c0_44 = arith.constant 0 : index
    %c0_45 = arith.constant 0 : index
    %115 = vector.load %arg11[%c0_44, %c0_45] : memref<8x32xf32, #tpu.memory_space<vmem>>, vector<8x32xf32>
    tpu.vector_store %arg11[%c0_44, %c0_45], %114 {strides = array<i32>} : memref<8x32xf32, #tpu.memory_space<vmem>>, vector<8x32xf32>,
    %116 = arith.index_cast %c1_i32 : i32 to index
    %c0_46 = arith.constant 0 : index
    %c0_47 = arith.constant 0 : index
    %117 = vector.load %arg12[%116, %c0_46, %c0_47] : memref<8x8x32xf32, #tpu.memory_space<vmem>>, vector<1x8x32xf32>
    %118 = vector.shape_cast %117 : vector<1x8x32xf32> to vector<8x32xf32>
    %119 = vector.shape_cast %114 : vector<8x32xf32> to vector<1x8x32xf32>
    tpu.vector_store %arg12[%116, %c0_46, %c0_47], %119 {strides = array<i32>} : memref<8x8x32xf32, #tpu.memory_space<vmem>>, vector<1x8x32xf32>,
    %c2_i32 = arith.constant 2 : i32
    %c0_48 = arith.constant 0 : index
    %c0_49 = arith.constant 0 : index
    %120 = vector.load %arg10[%c0_48, %c0_49] : memref<8x32xf32, #tpu.memory_space<vmem>>, vector<8x32xf32>
    %c0_50 = arith.constant 0 : index
    %c0_51 = arith.constant 0 : index
    %121 = vector.load %arg11[%c0_50, %c0_51] : memref<8x32xf32, #tpu.memory_space<vmem>>, vector<8x32xf32>
    %122 = arith.index_cast %c2_i32 : i32 to index
    %c0_52 = arith.constant 0 : index
    %c0_53 = arith.constant 0 : index
    %123 = vector.load %arg1[%122, %c0_52, %c0_53] : memref<8x8x96xf32, #tpu.memory_space<vmem>>, vector<1x8x96xf32>
    %124 = vector.shape_cast %123 : vector<1x8x96xf32> to vector<8x96xf32>
    %cst_54 = arith.constant dense<0.000000e+00> : vector<8x96xf32>
    %125 = tpu.matmul %120, %0, %cst_54 {dimension_numbers = #tpu.dot_dimension_numbers<[1], [0], [0], [1], [0, 0, 1, 1], [], []>} : vector<8x32xf32>, vector<32x96xf32>, vector<8x96xf32> -> vector<8x96xf32>
    %126 = vector.extract_strided_slice %124 {offsets = [0, 0], sizes = [8, 64], strides = [1, 1]} : vector<8x96xf32> to vector<8x64xf32>
    %127 = vector.extract_strided_slice %125 {offsets = [0, 0], sizes = [8, 64], strides = [1, 1]} : vector<8x96xf32> to vector<8x64xf32>
    %128 = arith.addf %126, %127 : vector<8x64xf32>
    %129 = arith.negf %128 : vector<8x64xf32>
    %130 = math.exp %129 : vector<8x64xf32>
    %cst_55 = arith.constant 1.000000e+00 : f32
    %131 = vector.broadcast %cst_55 : f32 to vector<8x64xf32>
    %132 = arith.addf %131, %130 : vector<8x64xf32>
    %133 = arith.divf %131, %132 : vector<8x64xf32>
    %134 = vector.extract_strided_slice %133 {offsets = [0, 0], sizes = [8, 32], strides = [1, 1]} : vector<8x64xf32> to vector<8x32xf32>
    %135 = vector.extract_strided_slice %133 {offsets = [0, 32], sizes = [8, 32], strides = [1, 1]} : vector<8x64xf32> to vector<8x32xf32>
    %136 = vector.extract_strided_slice %124 {offsets = [0, 64], sizes = [8, 32], strides = [1, 1]} : vector<8x96xf32> to vector<8x32xf32>
    %137 = vector.extract_strided_slice %125 {offsets = [0, 64], sizes = [8, 32], strides = [1, 1]} : vector<8x96xf32> to vector<8x32xf32>
    %138 = vector.broadcast %1 : vector<1x32xf32> to vector<8x32xf32>
    %139 = arith.addf %137, %138 : vector<8x32xf32>
    %140 = arith.mulf %134, %139 : vector<8x32xf32>
    %141 = arith.addf %136, %140 : vector<8x32xf32>
    %142 = math.tanh %141 : vector<8x32xf32>
    %cst_56 = arith.constant 1.000000e+00 : f32
    %143 = vector.broadcast %cst_56 : f32 to vector<8x32xf32>
    %144 = arith.subf %143, %135 : vector<8x32xf32>
    %145 = arith.mulf %144, %142 : vector<8x32xf32>
    %146 = arith.mulf %135, %120 : vector<8x32xf32>
    %147 = arith.addf %145, %146 : vector<8x32xf32>
    %c0_57 = arith.constant 0 : index
    %c0_58 = arith.constant 0 : index
    %148 = vector.load %arg10[%c0_57, %c0_58] : memref<8x32xf32, #tpu.memory_space<vmem>>, vector<8x32xf32>
    tpu.vector_store %arg10[%c0_57, %c0_58], %147 {strides = array<i32>} : memref<8x32xf32, #tpu.memory_space<vmem>>, vector<8x32xf32>,
    %149 = tpu.concatenate %147, %121 in 1 : vector<8x32xf32>, vector<8x32xf32> -> vector<8x64xf32>
    %cst_59 = arith.constant dense<0.000000e+00> : vector<8x128xf32>
    %150 = tpu.matmul %149, %2, %cst_59 {dimension_numbers = #tpu.dot_dimension_numbers<[1], [0], [0], [1], [0, 0, 1, 1], [], []>} : vector<8x64xf32>, vector<64x128xf32>, vector<8x128xf32> -> vector<8x128xf32>
    %151 = vector.broadcast %3 : vector<1x128xf32> to vector<8x128xf32>
    %152 = arith.addf %150, %151 : vector<8x128xf32>
    %153 = vector.extract_strided_slice %152 {offsets = [0, 0], sizes = [8, 64], strides = [1, 1]} : vector<8x128xf32> to vector<8x64xf32>
    %154 = arith.negf %153 : vector<8x64xf32>
    %155 = math.exp %154 : vector<8x64xf32>
    %cst_60 = arith.constant 1.000000e+00 : f32
    %156 = vector.broadcast %cst_60 : f32 to vector<8x64xf32>
    %157 = arith.addf %156, %155 : vector<8x64xf32>
    %158 = arith.divf %156, %157 : vector<8x64xf32>
    %159 = vector.extract_strided_slice %158 {offsets = [0, 0], sizes = [8, 32], strides = [1, 1]} : vector<8x64xf32> to vector<8x32xf32>
    %160 = vector.extract_strided_slice %158 {offsets = [0, 32], sizes = [8, 32], strides = [1, 1]} : vector<8x64xf32> to vector<8x32xf32>
    %161 = vector.extract_strided_slice %152 {offsets = [0, 64], sizes = [8, 32], strides = [1, 1]} : vector<8x128xf32> to vector<8x32xf32>
    %162 = vector.extract_strided_slice %152 {offsets = [0, 96], sizes = [8, 32], strides = [1, 1]} : vector<8x128xf32> to vector<8x32xf32>
    %163 = arith.mulf %159, %162 : vector<8x32xf32>
    %164 = arith.addf %161, %163 : vector<8x32xf32>
    %165 = math.tanh %164 : vector<8x32xf32>
    %cst_61 = arith.constant 1.000000e+00 : f32
    %166 = vector.broadcast %cst_61 : f32 to vector<8x32xf32>
    %167 = arith.subf %166, %160 : vector<8x32xf32>
    %168 = arith.mulf %167, %165 : vector<8x32xf32>
    %169 = arith.mulf %160, %121 : vector<8x32xf32>
    %170 = arith.addf %168, %169 : vector<8x32xf32>
    %c0_62 = arith.constant 0 : index
    %c0_63 = arith.constant 0 : index
    %171 = vector.load %arg11[%c0_62, %c0_63] : memref<8x32xf32, #tpu.memory_space<vmem>>, vector<8x32xf32>
    tpu.vector_store %arg11[%c0_62, %c0_63], %170 {strides = array<i32>} : memref<8x32xf32, #tpu.memory_space<vmem>>, vector<8x32xf32>,
    %172 = arith.index_cast %c2_i32 : i32 to index
    %c0_64 = arith.constant 0 : index
    %c0_65 = arith.constant 0 : index
    %173 = vector.load %arg12[%172, %c0_64, %c0_65] : memref<8x8x32xf32, #tpu.memory_space<vmem>>, vector<1x8x32xf32>
    %174 = vector.shape_cast %173 : vector<1x8x32xf32> to vector<8x32xf32>
    %175 = vector.shape_cast %170 : vector<8x32xf32> to vector<1x8x32xf32>
    tpu.vector_store %arg12[%172, %c0_64, %c0_65], %175 {strides = array<i32>} : memref<8x8x32xf32, #tpu.memory_space<vmem>>, vector<1x8x32xf32>,
    %c3_i32 = arith.constant 3 : i32
    %c0_66 = arith.constant 0 : index
    %c0_67 = arith.constant 0 : index
    %176 = vector.load %arg10[%c0_66, %c0_67] : memref<8x32xf32, #tpu.memory_space<vmem>>, vector<8x32xf32>
    %c0_68 = arith.constant 0 : index
    %c0_69 = arith.constant 0 : index
    %177 = vector.load %arg11[%c0_68, %c0_69] : memref<8x32xf32, #tpu.memory_space<vmem>>, vector<8x32xf32>
    %178 = arith.index_cast %c3_i32 : i32 to index
    %c0_70 = arith.constant 0 : index
    %c0_71 = arith.constant 0 : index
    %179 = vector.load %arg1[%178, %c0_70, %c0_71] : memref<8x8x96xf32, #tpu.memory_space<vmem>>, vector<1x8x96xf32>
    %180 = vector.shape_cast %179 : vector<1x8x96xf32> to vector<8x96xf32>
    %cst_72 = arith.constant dense<0.000000e+00> : vector<8x96xf32>
    %181 = tpu.matmul %176, %0, %cst_72 {dimension_numbers = #tpu.dot_dimension_numbers<[1], [0], [0], [1], [0, 0, 1, 1], [], []>} : vector<8x32xf32>, vector<32x96xf32>, vector<8x96xf32> -> vector<8x96xf32>
    %182 = vector.extract_strided_slice %180 {offsets = [0, 0], sizes = [8, 64], strides = [1, 1]} : vector<8x96xf32> to vector<8x64xf32>
    %183 = vector.extract_strided_slice %181 {offsets = [0, 0], sizes = [8, 64], strides = [1, 1]} : vector<8x96xf32> to vector<8x64xf32>
    %184 = arith.addf %182, %183 : vector<8x64xf32>
    %185 = arith.negf %184 : vector<8x64xf32>
    %186 = math.exp %185 : vector<8x64xf32>
    %cst_73 = arith.constant 1.000000e+00 : f32
    %187 = vector.broadcast %cst_73 : f32 to vector<8x64xf32>
    %188 = arith.addf %187, %186 : vector<8x64xf32>
    %189 = arith.divf %187, %188 : vector<8x64xf32>
    %190 = vector.extract_strided_slice %189 {offsets = [0, 0], sizes = [8, 32], strides = [1, 1]} : vector<8x64xf32> to vector<8x32xf32>
    %191 = vector.extract_strided_slice %189 {offsets = [0, 32], sizes = [8, 32], strides = [1, 1]} : vector<8x64xf32> to vector<8x32xf32>
    %192 = vector.extract_strided_slice %180 {offsets = [0, 64], sizes = [8, 32], strides = [1, 1]} : vector<8x96xf32> to vector<8x32xf32>
    %193 = vector.extract_strided_slice %181 {offsets = [0, 64], sizes = [8, 32], strides = [1, 1]} : vector<8x96xf32> to vector<8x32xf32>
    %194 = vector.broadcast %1 : vector<1x32xf32> to vector<8x32xf32>
    %195 = arith.addf %193, %194 : vector<8x32xf32>
    %196 = arith.mulf %190, %195 : vector<8x32xf32>
    %197 = arith.addf %192, %196 : vector<8x32xf32>
    %198 = math.tanh %197 : vector<8x32xf32>
    %cst_74 = arith.constant 1.000000e+00 : f32
    %199 = vector.broadcast %cst_74 : f32 to vector<8x32xf32>
    %200 = arith.subf %199, %191 : vector<8x32xf32>
    %201 = arith.mulf %200, %198 : vector<8x32xf32>
    %202 = arith.mulf %191, %176 : vector<8x32xf32>
    %203 = arith.addf %201, %202 : vector<8x32xf32>
    %c0_75 = arith.constant 0 : index
    %c0_76 = arith.constant 0 : index
    %204 = vector.load %arg10[%c0_75, %c0_76] : memref<8x32xf32, #tpu.memory_space<vmem>>, vector<8x32xf32>
    tpu.vector_store %arg10[%c0_75, %c0_76], %203 {strides = array<i32>} : memref<8x32xf32, #tpu.memory_space<vmem>>, vector<8x32xf32>,
    %205 = tpu.concatenate %203, %177 in 1 : vector<8x32xf32>, vector<8x32xf32> -> vector<8x64xf32>
    %cst_77 = arith.constant dense<0.000000e+00> : vector<8x128xf32>
    %206 = tpu.matmul %205, %2, %cst_77 {dimension_numbers = #tpu.dot_dimension_numbers<[1], [0], [0], [1], [0, 0, 1, 1], [], []>} : vector<8x64xf32>, vector<64x128xf32>, vector<8x128xf32> -> vector<8x128xf32>
    %207 = vector.broadcast %3 : vector<1x128xf32> to vector<8x128xf32>
    %208 = arith.addf %206, %207 : vector<8x128xf32>
    %209 = vector.extract_strided_slice %208 {offsets = [0, 0], sizes = [8, 64], strides = [1, 1]} : vector<8x128xf32> to vector<8x64xf32>
    %210 = arith.negf %209 : vector<8x64xf32>
    %211 = math.exp %210 : vector<8x64xf32>
    %cst_78 = arith.constant 1.000000e+00 : f32
    %212 = vector.broadcast %cst_78 : f32 to vector<8x64xf32>
    %213 = arith.addf %212, %211 : vector<8x64xf32>
    %214 = arith.divf %212, %213 : vector<8x64xf32>
    %215 = vector.extract_strided_slice %214 {offsets = [0, 0], sizes = [8, 32], strides = [1, 1]} : vector<8x64xf32> to vector<8x32xf32>
    %216 = vector.extract_strided_slice %214 {offsets = [0, 32], sizes = [8, 32], strides = [1, 1]} : vector<8x64xf32> to vector<8x32xf32>
    %217 = vector.extract_strided_slice %208 {offsets = [0, 64], sizes = [8, 32], strides = [1, 1]} : vector<8x128xf32> to vector<8x32xf32>
    %218 = vector.extract_strided_slice %208 {offsets = [0, 96], sizes = [8, 32], strides = [1, 1]} : vector<8x128xf32> to vector<8x32xf32>
    %219 = arith.mulf %215, %218 : vector<8x32xf32>
    %220 = arith.addf %217, %219 : vector<8x32xf32>
    %221 = math.tanh %220 : vector<8x32xf32>
    %cst_79 = arith.constant 1.000000e+00 : f32
    %222 = vector.broadcast %cst_79 : f32 to vector<8x32xf32>
    %223 = arith.subf %222, %216 : vector<8x32xf32>
    %224 = arith.mulf %223, %221 : vector<8x32xf32>
    %225 = arith.mulf %216, %177 : vector<8x32xf32>
    %226 = arith.addf %224, %225 : vector<8x32xf32>
    %c0_80 = arith.constant 0 : index
    %c0_81 = arith.constant 0 : index
    %227 = vector.load %arg11[%c0_80, %c0_81] : memref<8x32xf32, #tpu.memory_space<vmem>>, vector<8x32xf32>
    tpu.vector_store %arg11[%c0_80, %c0_81], %226 {strides = array<i32>} : memref<8x32xf32, #tpu.memory_space<vmem>>, vector<8x32xf32>,
    %228 = arith.index_cast %c3_i32 : i32 to index
    %c0_82 = arith.constant 0 : index
    %c0_83 = arith.constant 0 : index
    %229 = vector.load %arg12[%228, %c0_82, %c0_83] : memref<8x8x32xf32, #tpu.memory_space<vmem>>, vector<1x8x32xf32>
    %230 = vector.shape_cast %229 : vector<1x8x32xf32> to vector<8x32xf32>
    %231 = vector.shape_cast %226 : vector<8x32xf32> to vector<1x8x32xf32>
    tpu.vector_store %arg12[%228, %c0_82, %c0_83], %231 {strides = array<i32>} : memref<8x8x32xf32, #tpu.memory_space<vmem>>, vector<1x8x32xf32>,
    %c4_i32 = arith.constant 4 : i32
    %c0_84 = arith.constant 0 : index
    %c0_85 = arith.constant 0 : index
    %232 = vector.load %arg10[%c0_84, %c0_85] : memref<8x32xf32, #tpu.memory_space<vmem>>, vector<8x32xf32>
    %c0_86 = arith.constant 0 : index
    %c0_87 = arith.constant 0 : index
    %233 = vector.load %arg11[%c0_86, %c0_87] : memref<8x32xf32, #tpu.memory_space<vmem>>, vector<8x32xf32>
    %234 = arith.index_cast %c4_i32 : i32 to index
    %c0_88 = arith.constant 0 : index
    %c0_89 = arith.constant 0 : index
    %235 = vector.load %arg1[%234, %c0_88, %c0_89] : memref<8x8x96xf32, #tpu.memory_space<vmem>>, vector<1x8x96xf32>
    %236 = vector.shape_cast %235 : vector<1x8x96xf32> to vector<8x96xf32>
    %cst_90 = arith.constant dense<0.000000e+00> : vector<8x96xf32>
    %237 = tpu.matmul %232, %0, %cst_90 {dimension_numbers = #tpu.dot_dimension_numbers<[1], [0], [0], [1], [0, 0, 1, 1], [], []>} : vector<8x32xf32>, vector<32x96xf32>, vector<8x96xf32> -> vector<8x96xf32>
    %238 = vector.extract_strided_slice %236 {offsets = [0, 0], sizes = [8, 64], strides = [1, 1]} : vector<8x96xf32> to vector<8x64xf32>
    %239 = vector.extract_strided_slice %237 {offsets = [0, 0], sizes = [8, 64], strides = [1, 1]} : vector<8x96xf32> to vector<8x64xf32>
    %240 = arith.addf %238, %239 : vector<8x64xf32>
    %241 = arith.negf %240 : vector<8x64xf32>
    %242 = math.exp %241 : vector<8x64xf32>
    %cst_91 = arith.constant 1.000000e+00 : f32
    %243 = vector.broadcast %cst_91 : f32 to vector<8x64xf32>
    %244 = arith.addf %243, %242 : vector<8x64xf32>
    %245 = arith.divf %243, %244 : vector<8x64xf32>
    %246 = vector.extract_strided_slice %245 {offsets = [0, 0], sizes = [8, 32], strides = [1, 1]} : vector<8x64xf32> to vector<8x32xf32>
    %247 = vector.extract_strided_slice %245 {offsets = [0, 32], sizes = [8, 32], strides = [1, 1]} : vector<8x64xf32> to vector<8x32xf32>
    %248 = vector.extract_strided_slice %236 {offsets = [0, 64], sizes = [8, 32], strides = [1, 1]} : vector<8x96xf32> to vector<8x32xf32>
    %249 = vector.extract_strided_slice %237 {offsets = [0, 64], sizes = [8, 32], strides = [1, 1]} : vector<8x96xf32> to vector<8x32xf32>
    %250 = vector.broadcast %1 : vector<1x32xf32> to vector<8x32xf32>
    %251 = arith.addf %249, %250 : vector<8x32xf32>
    %252 = arith.mulf %246, %251 : vector<8x32xf32>
    %253 = arith.addf %248, %252 : vector<8x32xf32>
    %254 = math.tanh %253 : vector<8x32xf32>
    %cst_92 = arith.constant 1.000000e+00 : f32
    %255 = vector.broadcast %cst_92 : f32 to vector<8x32xf32>
    %256 = arith.subf %255, %247 : vector<8x32xf32>
    %257 = arith.mulf %256, %254 : vector<8x32xf32>
    %258 = arith.mulf %247, %232 : vector<8x32xf32>
    %259 = arith.addf %257, %258 : vector<8x32xf32>
    %c0_93 = arith.constant 0 : index
    %c0_94 = arith.constant 0 : index
    %260 = vector.load %arg10[%c0_93, %c0_94] : memref<8x32xf32, #tpu.memory_space<vmem>>, vector<8x32xf32>
    tpu.vector_store %arg10[%c0_93, %c0_94], %259 {strides = array<i32>} : memref<8x32xf32, #tpu.memory_space<vmem>>, vector<8x32xf32>,
    %261 = tpu.concatenate %259, %233 in 1 : vector<8x32xf32>, vector<8x32xf32> -> vector<8x64xf32>
    %cst_95 = arith.constant dense<0.000000e+00> : vector<8x128xf32>
    %262 = tpu.matmul %261, %2, %cst_95 {dimension_numbers = #tpu.dot_dimension_numbers<[1], [0], [0], [1], [0, 0, 1, 1], [], []>} : vector<8x64xf32>, vector<64x128xf32>, vector<8x128xf32> -> vector<8x128xf32>
    %263 = vector.broadcast %3 : vector<1x128xf32> to vector<8x128xf32>
    %264 = arith.addf %262, %263 : vector<8x128xf32>
    %265 = vector.extract_strided_slice %264 {offsets = [0, 0], sizes = [8, 64], strides = [1, 1]} : vector<8x128xf32> to vector<8x64xf32>
    %266 = arith.negf %265 : vector<8x64xf32>
    %267 = math.exp %266 : vector<8x64xf32>
    %cst_96 = arith.constant 1.000000e+00 : f32
    %268 = vector.broadcast %cst_96 : f32 to vector<8x64xf32>
    %269 = arith.addf %268, %267 : vector<8x64xf32>
    %270 = arith.divf %268, %269 : vector<8x64xf32>
    %271 = vector.extract_strided_slice %270 {offsets = [0, 0], sizes = [8, 32], strides = [1, 1]} : vector<8x64xf32> to vector<8x32xf32>
    %272 = vector.extract_strided_slice %270 {offsets = [0, 32], sizes = [8, 32], strides = [1, 1]} : vector<8x64xf32> to vector<8x32xf32>
    %273 = vector.extract_strided_slice %264 {offsets = [0, 64], sizes = [8, 32], strides = [1, 1]} : vector<8x128xf32> to vector<8x32xf32>
    %274 = vector.extract_strided_slice %264 {offsets = [0, 96], sizes = [8, 32], strides = [1, 1]} : vector<8x128xf32> to vector<8x32xf32>
    %275 = arith.mulf %271, %274 : vector<8x32xf32>
    %276 = arith.addf %273, %275 : vector<8x32xf32>
    %277 = math.tanh %276 : vector<8x32xf32>
    %cst_97 = arith.constant 1.000000e+00 : f32
    %278 = vector.broadcast %cst_97 : f32 to vector<8x32xf32>
    %279 = arith.subf %278, %272 : vector<8x32xf32>
    %280 = arith.mulf %279, %277 : vector<8x32xf32>
    %281 = arith.mulf %272, %233 : vector<8x32xf32>
    %282 = arith.addf %280, %281 : vector<8x32xf32>
    %c0_98 = arith.constant 0 : index
    %c0_99 = arith.constant 0 : index
    %283 = vector.load %arg11[%c0_98, %c0_99] : memref<8x32xf32, #tpu.memory_space<vmem>>, vector<8x32xf32>
    tpu.vector_store %arg11[%c0_98, %c0_99], %282 {strides = array<i32>} : memref<8x32xf32, #tpu.memory_space<vmem>>, vector<8x32xf32>,
    %284 = arith.index_cast %c4_i32 : i32 to index
    %c0_100 = arith.constant 0 : index
    %c0_101 = arith.constant 0 : index
    %285 = vector.load %arg12[%284, %c0_100, %c0_101] : memref<8x8x32xf32, #tpu.memory_space<vmem>>, vector<1x8x32xf32>
    %286 = vector.shape_cast %285 : vector<1x8x32xf32> to vector<8x32xf32>
    %287 = vector.shape_cast %282 : vector<8x32xf32> to vector<1x8x32xf32>
    tpu.vector_store %arg12[%284, %c0_100, %c0_101], %287 {strides = array<i32>} : memref<8x8x32xf32, #tpu.memory_space<vmem>>, vector<1x8x32xf32>,
    %c5_i32 = arith.constant 5 : i32
    %c0_102 = arith.constant 0 : index
    %c0_103 = arith.constant 0 : index
    %288 = vector.load %arg10[%c0_102, %c0_103] : memref<8x32xf32, #tpu.memory_space<vmem>>, vector<8x32xf32>
    %c0_104 = arith.constant 0 : index
    %c0_105 = arith.constant 0 : index
    %289 = vector.load %arg11[%c0_104, %c0_105] : memref<8x32xf32, #tpu.memory_space<vmem>>, vector<8x32xf32>
    %290 = arith.index_cast %c5_i32 : i32 to index
    %c0_106 = arith.constant 0 : index
    %c0_107 = arith.constant 0 : index
    %291 = vector.load %arg1[%290, %c0_106, %c0_107] : memref<8x8x96xf32, #tpu.memory_space<vmem>>, vector<1x8x96xf32>
    %292 = vector.shape_cast %291 : vector<1x8x96xf32> to vector<8x96xf32>
    %cst_108 = arith.constant dense<0.000000e+00> : vector<8x96xf32>
    %293 = tpu.matmul %288, %0, %cst_108 {dimension_numbers = #tpu.dot_dimension_numbers<[1], [0], [0], [1], [0, 0, 1, 1], [], []>} : vector<8x32xf32>, vector<32x96xf32>, vector<8x96xf32> -> vector<8x96xf32>
    %294 = vector.extract_strided_slice %292 {offsets = [0, 0], sizes = [8, 64], strides = [1, 1]} : vector<8x96xf32> to vector<8x64xf32>
    %295 = vector.extract_strided_slice %293 {offsets = [0, 0], sizes = [8, 64], strides = [1, 1]} : vector<8x96xf32> to vector<8x64xf32>
    %296 = arith.addf %294, %295 : vector<8x64xf32>
    %297 = arith.negf %296 : vector<8x64xf32>
    %298 = math.exp %297 : vector<8x64xf32>
    %cst_109 = arith.constant 1.000000e+00 : f32
    %299 = vector.broadcast %cst_109 : f32 to vector<8x64xf32>
    %300 = arith.addf %299, %298 : vector<8x64xf32>
    %301 = arith.divf %299, %300 : vector<8x64xf32>
    %302 = vector.extract_strided_slice %301 {offsets = [0, 0], sizes = [8, 32], strides = [1, 1]} : vector<8x64xf32> to vector<8x32xf32>
    %303 = vector.extract_strided_slice %301 {offsets = [0, 32], sizes = [8, 32], strides = [1, 1]} : vector<8x64xf32> to vector<8x32xf32>
    %304 = vector.extract_strided_slice %292 {offsets = [0, 64], sizes = [8, 32], strides = [1, 1]} : vector<8x96xf32> to vector<8x32xf32>
    %305 = vector.extract_strided_slice %293 {offsets = [0, 64], sizes = [8, 32], strides = [1, 1]} : vector<8x96xf32> to vector<8x32xf32>
    %306 = vector.broadcast %1 : vector<1x32xf32> to vector<8x32xf32>
    %307 = arith.addf %305, %306 : vector<8x32xf32>
    %308 = arith.mulf %302, %307 : vector<8x32xf32>
    %309 = arith.addf %304, %308 : vector<8x32xf32>
    %310 = math.tanh %309 : vector<8x32xf32>
    %cst_110 = arith.constant 1.000000e+00 : f32
    %311 = vector.broadcast %cst_110 : f32 to vector<8x32xf32>
    %312 = arith.subf %311, %303 : vector<8x32xf32>
    %313 = arith.mulf %312, %310 : vector<8x32xf32>
    %314 = arith.mulf %303, %288 : vector<8x32xf32>
    %315 = arith.addf %313, %314 : vector<8x32xf32>
    %c0_111 = arith.constant 0 : index
    %c0_112 = arith.constant 0 : index
    %316 = vector.load %arg10[%c0_111, %c0_112] : memref<8x32xf32, #tpu.memory_space<vmem>>, vector<8x32xf32>
    tpu.vector_store %arg10[%c0_111, %c0_112], %315 {strides = array<i32>} : memref<8x32xf32, #tpu.memory_space<vmem>>, vector<8x32xf32>,
    %317 = tpu.concatenate %315, %289 in 1 : vector<8x32xf32>, vector<8x32xf32> -> vector<8x64xf32>
    %cst_113 = arith.constant dense<0.000000e+00> : vector<8x128xf32>
    %318 = tpu.matmul %317, %2, %cst_113 {dimension_numbers = #tpu.dot_dimension_numbers<[1], [0], [0], [1], [0, 0, 1, 1], [], []>} : vector<8x64xf32>, vector<64x128xf32>, vector<8x128xf32> -> vector<8x128xf32>
    %319 = vector.broadcast %3 : vector<1x128xf32> to vector<8x128xf32>
    %320 = arith.addf %318, %319 : vector<8x128xf32>
    %321 = vector.extract_strided_slice %320 {offsets = [0, 0], sizes = [8, 64], strides = [1, 1]} : vector<8x128xf32> to vector<8x64xf32>
    %322 = arith.negf %321 : vector<8x64xf32>
    %323 = math.exp %322 : vector<8x64xf32>
    %cst_114 = arith.constant 1.000000e+00 : f32
    %324 = vector.broadcast %cst_114 : f32 to vector<8x64xf32>
    %325 = arith.addf %324, %323 : vector<8x64xf32>
    %326 = arith.divf %324, %325 : vector<8x64xf32>
    %327 = vector.extract_strided_slice %326 {offsets = [0, 0], sizes = [8, 32], strides = [1, 1]} : vector<8x64xf32> to vector<8x32xf32>
    %328 = vector.extract_strided_slice %326 {offsets = [0, 32], sizes = [8, 32], strides = [1, 1]} : vector<8x64xf32> to vector<8x32xf32>
    %329 = vector.extract_strided_slice %320 {offsets = [0, 64], sizes = [8, 32], strides = [1, 1]} : vector<8x128xf32> to vector<8x32xf32>
    %330 = vector.extract_strided_slice %320 {offsets = [0, 96], sizes = [8, 32], strides = [1, 1]} : vector<8x128xf32> to vector<8x32xf32>
    %331 = arith.mulf %327, %330 : vector<8x32xf32>
    %332 = arith.addf %329, %331 : vector<8x32xf32>
    %333 = math.tanh %332 : vector<8x32xf32>
    %cst_115 = arith.constant 1.000000e+00 : f32
    %334 = vector.broadcast %cst_115 : f32 to vector<8x32xf32>
    %335 = arith.subf %334, %328 : vector<8x32xf32>
    %336 = arith.mulf %335, %333 : vector<8x32xf32>
    %337 = arith.mulf %328, %289 : vector<8x32xf32>
    %338 = arith.addf %336, %337 : vector<8x32xf32>
    %c0_116 = arith.constant 0 : index
    %c0_117 = arith.constant 0 : index
    %339 = vector.load %arg11[%c0_116, %c0_117] : memref<8x32xf32, #tpu.memory_space<vmem>>, vector<8x32xf32>
    tpu.vector_store %arg11[%c0_116, %c0_117], %338 {strides = array<i32>} : memref<8x32xf32, #tpu.memory_space<vmem>>, vector<8x32xf32>,
    %340 = arith.index_cast %c5_i32 : i32 to index
    %c0_118 = arith.constant 0 : index
    %c0_119 = arith.constant 0 : index
    %341 = vector.load %arg12[%340, %c0_118, %c0_119] : memref<8x8x32xf32, #tpu.memory_space<vmem>>, vector<1x8x32xf32>
    %342 = vector.shape_cast %341 : vector<1x8x32xf32> to vector<8x32xf32>
    %343 = vector.shape_cast %338 : vector<8x32xf32> to vector<1x8x32xf32>
    tpu.vector_store %arg12[%340, %c0_118, %c0_119], %343 {strides = array<i32>} : memref<8x8x32xf32, #tpu.memory_space<vmem>>, vector<1x8x32xf32>,
    %c6_i32 = arith.constant 6 : i32
    %c0_120 = arith.constant 0 : index
    %c0_121 = arith.constant 0 : index
    %344 = vector.load %arg10[%c0_120, %c0_121] : memref<8x32xf32, #tpu.memory_space<vmem>>, vector<8x32xf32>
    %c0_122 = arith.constant 0 : index
    %c0_123 = arith.constant 0 : index
    %345 = vector.load %arg11[%c0_122, %c0_123] : memref<8x32xf32, #tpu.memory_space<vmem>>, vector<8x32xf32>
    %346 = arith.index_cast %c6_i32 : i32 to index
    %c0_124 = arith.constant 0 : index
    %c0_125 = arith.constant 0 : index
    %347 = vector.load %arg1[%346, %c0_124, %c0_125] : memref<8x8x96xf32, #tpu.memory_space<vmem>>, vector<1x8x96xf32>
    %348 = vector.shape_cast %347 : vector<1x8x96xf32> to vector<8x96xf32>
    %cst_126 = arith.constant dense<0.000000e+00> : vector<8x96xf32>
    %349 = tpu.matmul %344, %0, %cst_126 {dimension_numbers = #tpu.dot_dimension_numbers<[1], [0], [0], [1], [0, 0, 1, 1], [], []>} : vector<8x32xf32>, vector<32x96xf32>, vector<8x96xf32> -> vector<8x96xf32>
    %350 = vector.extract_strided_slice %348 {offsets = [0, 0], sizes = [8, 64], strides = [1, 1]} : vector<8x96xf32> to vector<8x64xf32>
    %351 = vector.extract_strided_slice %349 {offsets = [0, 0], sizes = [8, 64], strides = [1, 1]} : vector<8x96xf32> to vector<8x64xf32>
    %352 = arith.addf %350, %351 : vector<8x64xf32>
    %353 = arith.negf %352 : vector<8x64xf32>
    %354 = math.exp %353 : vector<8x64xf32>
    %cst_127 = arith.constant 1.000000e+00 : f32
    %355 = vector.broadcast %cst_127 : f32 to vector<8x64xf32>
    %356 = arith.addf %355, %354 : vector<8x64xf32>
    %357 = arith.divf %355, %356 : vector<8x64xf32>
    %358 = vector.extract_strided_slice %357 {offsets = [0, 0], sizes = [8, 32], strides = [1, 1]} : vector<8x64xf32> to vector<8x32xf32>
    %359 = vector.extract_strided_slice %357 {offsets = [0, 32], sizes = [8, 32], strides = [1, 1]} : vector<8x64xf32> to vector<8x32xf32>
    %360 = vector.extract_strided_slice %348 {offsets = [0, 64], sizes = [8, 32], strides = [1, 1]} : vector<8x96xf32> to vector<8x32xf32>
    %361 = vector.extract_strided_slice %349 {offsets = [0, 64], sizes = [8, 32], strides = [1, 1]} : vector<8x96xf32> to vector<8x32xf32>
    %362 = vector.broadcast %1 : vector<1x32xf32> to vector<8x32xf32>
    %363 = arith.addf %361, %362 : vector<8x32xf32>
    %364 = arith.mulf %358, %363 : vector<8x32xf32>
    %365 = arith.addf %360, %364 : vector<8x32xf32>
    %366 = math.tanh %365 : vector<8x32xf32>
    %cst_128 = arith.constant 1.000000e+00 : f32
    %367 = vector.broadcast %cst_128 : f32 to vector<8x32xf32>
    %368 = arith.subf %367, %359 : vector<8x32xf32>
    %369 = arith.mulf %368, %366 : vector<8x32xf32>
    %370 = arith.mulf %359, %344 : vector<8x32xf32>
    %371 = arith.addf %369, %370 : vector<8x32xf32>
    %c0_129 = arith.constant 0 : index
    %c0_130 = arith.constant 0 : index
    %372 = vector.load %arg10[%c0_129, %c0_130] : memref<8x32xf32, #tpu.memory_space<vmem>>, vector<8x32xf32>
    tpu.vector_store %arg10[%c0_129, %c0_130], %371 {strides = array<i32>} : memref<8x32xf32, #tpu.memory_space<vmem>>, vector<8x32xf32>,
    %373 = tpu.concatenate %371, %345 in 1 : vector<8x32xf32>, vector<8x32xf32> -> vector<8x64xf32>
    %cst_131 = arith.constant dense<0.000000e+00> : vector<8x128xf32>
    %374 = tpu.matmul %373, %2, %cst_131 {dimension_numbers = #tpu.dot_dimension_numbers<[1], [0], [0], [1], [0, 0, 1, 1], [], []>} : vector<8x64xf32>, vector<64x128xf32>, vector<8x128xf32> -> vector<8x128xf32>
    %375 = vector.broadcast %3 : vector<1x128xf32> to vector<8x128xf32>
    %376 = arith.addf %374, %375 : vector<8x128xf32>
    %377 = vector.extract_strided_slice %376 {offsets = [0, 0], sizes = [8, 64], strides = [1, 1]} : vector<8x128xf32> to vector<8x64xf32>
    %378 = arith.negf %377 : vector<8x64xf32>
    %379 = math.exp %378 : vector<8x64xf32>
    %cst_132 = arith.constant 1.000000e+00 : f32
    %380 = vector.broadcast %cst_132 : f32 to vector<8x64xf32>
    %381 = arith.addf %380, %379 : vector<8x64xf32>
    %382 = arith.divf %380, %381 : vector<8x64xf32>
    %383 = vector.extract_strided_slice %382 {offsets = [0, 0], sizes = [8, 32], strides = [1, 1]} : vector<8x64xf32> to vector<8x32xf32>
    %384 = vector.extract_strided_slice %382 {offsets = [0, 32], sizes = [8, 32], strides = [1, 1]} : vector<8x64xf32> to vector<8x32xf32>
    %385 = vector.extract_strided_slice %376 {offsets = [0, 64], sizes = [8, 32], strides = [1, 1]} : vector<8x128xf32> to vector<8x32xf32>
    %386 = vector.extract_strided_slice %376 {offsets = [0, 96], sizes = [8, 32], strides = [1, 1]} : vector<8x128xf32> to vector<8x32xf32>
    %387 = arith.mulf %383, %386 : vector<8x32xf32>
    %388 = arith.addf %385, %387 : vector<8x32xf32>
    %389 = math.tanh %388 : vector<8x32xf32>
    %cst_133 = arith.constant 1.000000e+00 : f32
    %390 = vector.broadcast %cst_133 : f32 to vector<8x32xf32>
    %391 = arith.subf %390, %384 : vector<8x32xf32>
    %392 = arith.mulf %391, %389 : vector<8x32xf32>
    %393 = arith.mulf %384, %345 : vector<8x32xf32>
    %394 = arith.addf %392, %393 : vector<8x32xf32>
    %c0_134 = arith.constant 0 : index
    %c0_135 = arith.constant 0 : index
    %395 = vector.load %arg11[%c0_134, %c0_135] : memref<8x32xf32, #tpu.memory_space<vmem>>, vector<8x32xf32>
    tpu.vector_store %arg11[%c0_134, %c0_135], %394 {strides = array<i32>} : memref<8x32xf32, #tpu.memory_space<vmem>>, vector<8x32xf32>,
    %396 = arith.index_cast %c6_i32 : i32 to index
    %c0_136 = arith.constant 0 : index
    %c0_137 = arith.constant 0 : index
    %397 = vector.load %arg12[%396, %c0_136, %c0_137] : memref<8x8x32xf32, #tpu.memory_space<vmem>>, vector<1x8x32xf32>
    %398 = vector.shape_cast %397 : vector<1x8x32xf32> to vector<8x32xf32>
    %399 = vector.shape_cast %394 : vector<8x32xf32> to vector<1x8x32xf32>
    tpu.vector_store %arg12[%396, %c0_136, %c0_137], %399 {strides = array<i32>} : memref<8x8x32xf32, #tpu.memory_space<vmem>>, vector<1x8x32xf32>,
    %c7_i32 = arith.constant 7 : i32
    %c0_138 = arith.constant 0 : index
    %c0_139 = arith.constant 0 : index
    %400 = vector.load %arg10[%c0_138, %c0_139] : memref<8x32xf32, #tpu.memory_space<vmem>>, vector<8x32xf32>
    %c0_140 = arith.constant 0 : index
    %c0_141 = arith.constant 0 : index
    %401 = vector.load %arg11[%c0_140, %c0_141] : memref<8x32xf32, #tpu.memory_space<vmem>>, vector<8x32xf32>
    %402 = arith.index_cast %c7_i32 : i32 to index
    %c0_142 = arith.constant 0 : index
    %c0_143 = arith.constant 0 : index
    %403 = vector.load %arg1[%402, %c0_142, %c0_143] : memref<8x8x96xf32, #tpu.memory_space<vmem>>, vector<1x8x96xf32>
    %404 = vector.shape_cast %403 : vector<1x8x96xf32> to vector<8x96xf32>
    %cst_144 = arith.constant dense<0.000000e+00> : vector<8x96xf32>
    %405 = tpu.matmul %400, %0, %cst_144 {dimension_numbers = #tpu.dot_dimension_numbers<[1], [0], [0], [1], [0, 0, 1, 1], [], []>} : vector<8x32xf32>, vector<32x96xf32>, vector<8x96xf32> -> vector<8x96xf32>
    %406 = vector.extract_strided_slice %404 {offsets = [0, 0], sizes = [8, 64], strides = [1, 1]} : vector<8x96xf32> to vector<8x64xf32>
    %407 = vector.extract_strided_slice %405 {offsets = [0, 0], sizes = [8, 64], strides = [1, 1]} : vector<8x96xf32> to vector<8x64xf32>
    %408 = arith.addf %406, %407 : vector<8x64xf32>
    %409 = arith.negf %408 : vector<8x64xf32>
    %410 = math.exp %409 : vector<8x64xf32>
    %cst_145 = arith.constant 1.000000e+00 : f32
    %411 = vector.broadcast %cst_145 : f32 to vector<8x64xf32>
    %412 = arith.addf %411, %410 : vector<8x64xf32>
    %413 = arith.divf %411, %412 : vector<8x64xf32>
    %414 = vector.extract_strided_slice %413 {offsets = [0, 0], sizes = [8, 32], strides = [1, 1]} : vector<8x64xf32> to vector<8x32xf32>
    %415 = vector.extract_strided_slice %413 {offsets = [0, 32], sizes = [8, 32], strides = [1, 1]} : vector<8x64xf32> to vector<8x32xf32>
    %416 = vector.extract_strided_slice %404 {offsets = [0, 64], sizes = [8, 32], strides = [1, 1]} : vector<8x96xf32> to vector<8x32xf32>
    %417 = vector.extract_strided_slice %405 {offsets = [0, 64], sizes = [8, 32], strides = [1, 1]} : vector<8x96xf32> to vector<8x32xf32>
    %418 = vector.broadcast %1 : vector<1x32xf32> to vector<8x32xf32>
    %419 = arith.addf %417, %418 : vector<8x32xf32>
    %420 = arith.mulf %414, %419 : vector<8x32xf32>
    %421 = arith.addf %416, %420 : vector<8x32xf32>
    %422 = math.tanh %421 : vector<8x32xf32>
    %cst_146 = arith.constant 1.000000e+00 : f32
    %423 = vector.broadcast %cst_146 : f32 to vector<8x32xf32>
    %424 = arith.subf %423, %415 : vector<8x32xf32>
    %425 = arith.mulf %424, %422 : vector<8x32xf32>
    %426 = arith.mulf %415, %400 : vector<8x32xf32>
    %427 = arith.addf %425, %426 : vector<8x32xf32>
    %c0_147 = arith.constant 0 : index
    %c0_148 = arith.constant 0 : index
    %428 = vector.load %arg10[%c0_147, %c0_148] : memref<8x32xf32, #tpu.memory_space<vmem>>, vector<8x32xf32>
    tpu.vector_store %arg10[%c0_147, %c0_148], %427 {strides = array<i32>} : memref<8x32xf32, #tpu.memory_space<vmem>>, vector<8x32xf32>,
    %429 = tpu.concatenate %427, %401 in 1 : vector<8x32xf32>, vector<8x32xf32> -> vector<8x64xf32>
    %cst_149 = arith.constant dense<0.000000e+00> : vector<8x128xf32>
    %430 = tpu.matmul %429, %2, %cst_149 {dimension_numbers = #tpu.dot_dimension_numbers<[1], [0], [0], [1], [0, 0, 1, 1], [], []>} : vector<8x64xf32>, vector<64x128xf32>, vector<8x128xf32> -> vector<8x128xf32>
    %431 = vector.broadcast %3 : vector<1x128xf32> to vector<8x128xf32>
    %432 = arith.addf %430, %431 : vector<8x128xf32>
    %433 = vector.extract_strided_slice %432 {offsets = [0, 0], sizes = [8, 64], strides = [1, 1]} : vector<8x128xf32> to vector<8x64xf32>
    %434 = arith.negf %433 : vector<8x64xf32>
    %435 = math.exp %434 : vector<8x64xf32>
    %cst_150 = arith.constant 1.000000e+00 : f32
    %436 = vector.broadcast %cst_150 : f32 to vector<8x64xf32>
    %437 = arith.addf %436, %435 : vector<8x64xf32>
    %438 = arith.divf %436, %437 : vector<8x64xf32>
    %439 = vector.extract_strided_slice %438 {offsets = [0, 0], sizes = [8, 32], strides = [1, 1]} : vector<8x64xf32> to vector<8x32xf32>
    %440 = vector.extract_strided_slice %438 {offsets = [0, 32], sizes = [8, 32], strides = [1, 1]} : vector<8x64xf32> to vector<8x32xf32>
    %441 = vector.extract_strided_slice %432 {offsets = [0, 64], sizes = [8, 32], strides = [1, 1]} : vector<8x128xf32> to vector<8x32xf32>
    %442 = vector.extract_strided_slice %432 {offsets = [0, 96], sizes = [8, 32], strides = [1, 1]} : vector<8x128xf32> to vector<8x32xf32>
    %443 = arith.mulf %439, %442 : vector<8x32xf32>
    %444 = arith.addf %441, %443 : vector<8x32xf32>
    %445 = math.tanh %444 : vector<8x32xf32>
    %cst_151 = arith.constant 1.000000e+00 : f32
    %446 = vector.broadcast %cst_151 : f32 to vector<8x32xf32>
    %447 = arith.subf %446, %440 : vector<8x32xf32>
    %448 = arith.mulf %447, %445 : vector<8x32xf32>
    %449 = arith.mulf %440, %401 : vector<8x32xf32>
    %450 = arith.addf %448, %449 : vector<8x32xf32>
    %c0_152 = arith.constant 0 : index
    %c0_153 = arith.constant 0 : index
    %451 = vector.load %arg11[%c0_152, %c0_153] : memref<8x32xf32, #tpu.memory_space<vmem>>, vector<8x32xf32>
    tpu.vector_store %arg11[%c0_152, %c0_153], %450 {strides = array<i32>} : memref<8x32xf32, #tpu.memory_space<vmem>>, vector<8x32xf32>,
    %452 = arith.index_cast %c7_i32 : i32 to index
    %c0_154 = arith.constant 0 : index
    %c0_155 = arith.constant 0 : index
    %453 = vector.load %arg12[%452, %c0_154, %c0_155] : memref<8x8x32xf32, #tpu.memory_space<vmem>>, vector<1x8x32xf32>
    %454 = vector.shape_cast %453 : vector<1x8x32xf32> to vector<8x32xf32>
    %455 = vector.shape_cast %450 : vector<8x32xf32> to vector<1x8x32xf32>
    tpu.vector_store %arg12[%452, %c0_154, %c0_155], %455 {strides = array<i32>} : memref<8x8x32xf32, #tpu.memory_space<vmem>>, vector<1x8x32xf32>,
    %c8_i32 = arith.constant 8 : i32
    %c0_156 = arith.constant 0 : index
    %c0_157 = arith.constant 0 : index
    %456 = vector.load %arg2[%c0_156, %c0_157] : memref<8x1xi32, #tpu.memory_space<vmem>>, vector<8x1xi32>
    %457 = tpu.iota {dimensions = array<i32: 0>} : vector<8x8x32xi32>
    %458 = vector.shape_cast %456 : vector<8x1xi32> to vector<1x8x1xi32>
    %459 = vector.broadcast %458 : vector<1x8x1xi32> to vector<8x8x32xi32>
    %460 = arith.cmpi slt, %457, %459 : vector<8x8x32xi32>
    %c0_158 = arith.constant 0 : index
    %c0_159 = arith.constant 0 : index
    %c0_160 = arith.constant 0 : index
    %461 = vector.load %arg12[%c0_158, %c0_159, %c0_160] : memref<8x8x32xf32, #tpu.memory_space<vmem>>, vector<8x8x32xf32>
    %cst_161 = arith.constant 0.000000e+00 : f32
    %462 = vector.broadcast %cst_161 : f32 to vector<8x8x32xf32>
    %463 = arith.select %460, %461, %462 : vector<8x8x32xi1>, vector<8x8x32xf32>
    %464 = vector.shape_cast %463 : vector<8x8x32xf32> to vector<64x32xf32>
    %c0_162 = arith.constant 0 : index
    %c0_163 = arith.constant 0 : index
    %465 = vector.load %arg7[%c0_162, %c0_163] : memref<32x8xf32, #tpu.memory_space<vmem>>, vector<32x8xf32>
    %cst_164 = arith.constant dense<0.000000e+00> : vector<64x8xf32>
    %466 = tpu.matmul %464, %465, %cst_164 {dimension_numbers = #tpu.dot_dimension_numbers<[1], [0], [0], [1], [0, 0, 1, 1], [], []>} : vector<64x32xf32>, vector<32x8xf32>, vector<64x8xf32> -> vector<64x8xf32>
    %c0_165 = arith.constant 0 : index
    %c0_166 = arith.constant 0 : index
    %467 = vector.load %arg8[%c0_165, %c0_166] : memref<1x8xf32, #tpu.memory_space<vmem>>, vector<1x8xf32>
    %468 = vector.broadcast %467 : vector<1x8xf32> to vector<64x8xf32>
    %469 = arith.addf %466, %468 : vector<64x8xf32>
    %470 = vector.shape_cast %469 : vector<64x8xf32> to vector<8x8x8xf32>
    %c0_167 = arith.constant 0 : index
    %c0_168 = arith.constant 0 : index
    %c0_169 = arith.constant 0 : index
    %471 = vector.load %arg9[%c0_167, %c0_168, %c0_169] : memref<8x8x8xf32, #tpu.memory_space<vmem>>, vector<8x8x8xf32>
    tpu.vector_store %arg9[%c0_167, %c0_168, %c0_169], %470 {strides = array<i32>} : memref<8x8x8xf32, #tpu.memory_space<vmem>>, vector<8x8x8xf32>,
    return
  }
  func.func @transform_0(%arg0: i32) -> (i32, i32, i32) {
    %c0_i32 = arith.constant 0 : i32
    %c0_i32_0 = arith.constant 0 : i32
    %c0_i32_1 = arith.constant 0 : i32
    return %c0_i32, %arg0, %c0_i32_0 : i32, i32, i32
  }
  func.func @transform_1(%arg0: i32) -> (i32, i32) {
    %c0_i32 = arith.constant 0 : i32
    %c0_i32_0 = arith.constant 0 : i32
    return %arg0, %c0_i32 : i32, i32
  }
  func.func @transform_2(%arg0: i32) -> (i32, i32) {
    %c0_i32 = arith.constant 0 : i32
    %c0_i32_0 = arith.constant 0 : i32
    %c0_i32_1 = arith.constant 0 : i32
    return %c0_i32, %c0_i32_0 : i32, i32
  }
  func.func @transform_3(%arg0: i32) -> (i32, i32) {
    %c0_i32 = arith.constant 0 : i32
    %c0_i32_0 = arith.constant 0 : i32
    %c0_i32_1 = arith.constant 0 : i32
    return %c0_i32, %c0_i32_0 : i32, i32
  }
  func.func @transform_4(%arg0: i32) -> (i32, i32) {
    %c0_i32 = arith.constant 0 : i32
    %c0_i32_0 = arith.constant 0 : i32
    %c0_i32_1 = arith.constant 0 : i32
    return %c0_i32, %c0_i32_0 : i32, i32
  }
  func.func @transform_5(%arg0: i32) -> (i32, i32) {
    %c0_i32 = arith.constant 0 : i32
    %c0_i32_0 = arith.constant 0 : i32
    %c0_i32_1 = arith.constant 0 : i32
    return %c0_i32, %c0_i32_0 : i32, i32
  }
  func.func @transform_6(%arg0: i32) -> (i32, i32) {
    %c0_i32 = arith.constant 0 : i32
    %c0_i32_0 = arith.constant 0 : i32
    %c0_i32_1 = arith.constant 0 : i32
    return %c0_i32, %c0_i32_0 : i32, i32
  }
  func.func @transform_7(%arg0: i32) -> (i32, i32) {
    %c0_i32 = arith.constant 0 : i32
    %c0_i32_0 = arith.constant 0 : i32
    %c0_i32_1 = arith.constant 0 : i32
    return %c0_i32, %c0_i32_0 : i32, i32
  }
  func.func @transform_8(%arg0: i32) -> (i32, i32, i32) {
    %c0_i32 = arith.constant 0 : i32
    %c0_i32_0 = arith.constant 0 : i32
    %c0_i32_1 = arith.constant 0 : i32
    return %c0_i32, %arg0, %c0_i32_0 : i32, i32, i32
  }
}

</mosaic_0001>

<bundles_post_ra>
// kernel: step_ahead_tracknet.1
= control target key start
LH: loop header
LB: loop body
LE: loop exit
PB: predicated region body
PF: predicated region fallthrough
CT: control target
= control target key end

     0   :  { %vm43_vm0 = vcmask 261120   ;;  %v2707_v0 = vmov 0.0|0.0   ;;  %vm2708_vm1 = vmmov 0   ;;  %v2709_v4 = vmov 0.0   ;;  %s2710_s15 = smov 64   ;;  %s2712_s29 = smov 96   ;;  %s3196_s2 = inlined_call_operand.vmem [shape: f32[32,96], index: 2, kind: input, shape index: {}]   ;;  %s3197_s3 = inlined_call_operand.vmem [shape: f32[1,32], index: 3, kind: input, shape index: {}]   ;;  %s3198_s0 = inlined_call_operand.vmem [shape: f32[8,8,96], index: 0, kind: input, shape index: {}]   ;;  %s3199_s4 = inlined_call_operand.vmem [shape: f32[64,128], index: 4, kind: input, shape index: {}]   ;;  %s3200_s5 = inlined_call_operand.vmem [shape: f32[1,128], index: 5, kind: input, shape index: {}]   ;;  %s3201_s6 = inlined_call_operand.vmem [shape: f32[32,8], index: 6, kind: input, shape index: {}]   ;;  %s3202_s1 = inlined_call_operand.vmem [shape: s32[8,1], index: 1, kind: input, shape index: {}]   ;;  %s3203_s7 = inlined_call_operand.vmem [shape: f32[1,8], index: 7, kind: input, shape index: {}]   ;;  %s3204_s8 = inlined_call_operand.vmem [shape: f32[8,8,8], index: 8, kind: output, shape index: {}]  }
   0x1   :  { %2450 = vmatprep.subr.bf16.mxu0 %v2707_v0  ;;  %v29_v1 = vld [vmem:[%s3196_s2] sm:$0xff]  ;;  %v30_v2 = vld [vmem:[%s3196_s2 + $0x8] sm:$0xff]  ;;  %v31_v3 = vld [vmem:[%s3196_s2 + $0x10] sm:$0xff]  ;;  %2198 = vmatprep.mubr.msk.f32.mxu0 %vm2708_vm1, %v2709_v4  ;;  %44 = vst.msk [vmem:[#allocation2] sm:$0xff] %vm43_vm0, %v2709_v4  ;;  %vm176_vm2 = vcmask 523264   ;;  %vm2003_vm10 = vcmask 64512  }
   0x2   :  { %45 = vst.msk [vmem:[#allocation3] sm:$0xff] %vm43_vm0, %v2709_v4  ;;  %v2775_v5 = vpack.c.bf16 %v30_v2, %v29_v1  ;;  %v32_v6 = vld [vmem:[%s3196_s2 + $0x18] sm:$0xff]  ;;  %v2018_v7 = vld [vmem:[%s3197_s3] ss:$0 sm:$0xff]  ;;  %2456 = vmatprep.subr.bf16.mxu1 %v2707_v0  ;;  %2217 = vmatprep.mubr.msk.f32.mxu1 %vm2708_vm1, %v2709_v4  ;;  %s2711_s2 = smov 32   ;;  %v35_v26 = vld [vmem:[%s3199_s4 + $0x8] sm:$0xff] }
   0x3   :  { %134 = vrot.lane.b32.xlu0 %v2018_v7, %s2710_s15  ;;  %v2788_v8 = vpack.c.bf16 %v32_v6, %v31_v3  ;;  %v48_v14 = vld [vmem:[%s3198_s0] sm:$0xff]  ;;  %v36_v27 = vld [vmem:[%s3199_s4 + $0x10] sm:$0xff]  ;;  %v37_v29 = vld [vmem:[%s3199_s4 + $0x18] sm:$0xff] }
   0x4   :  { %2452 = vmatpush3.bf16.msra.mxu0 %v2775_v5  ;;  %v34_v25 = vld [vmem:[%s3199_s4] sm:$0xff]  ;;  %v2825_v30 = vpack.c.bf16 %v37_v29, %v36_v27  ;;  %v39_v32 = vld [vmem:[%s3199_s4 + $0x28] sm:$0xff]  ;;  %v40_v35 = vld [vmem:[%s3199_s4 + $0x30] sm:$0xff] }
   0x5   :  { %2453 = vmatprep.subr.bf16.mxu0 %v2707_v0  ;;  %v2819_v28 = vpack.c.bf16 %v35_v26, %v34_v25  ;;  %v38_v31 = vld [vmem:[%s3199_s4 + $0x20] sm:$0xff]  ;;  %v41_v36 = vld [vmem:[%s3199_s4 + $0x38] sm:$0xff]  ;;  %v2022_v56 = vld [vmem:[%s3198_s0 + $0x8] sm:$0xff] }
   0x6   :  { %v2835_v34 = vpack.c.bf16 %v39_v32, %v38_v31  ;;  %v2846_v37 = vpack.c.bf16 %v41_v36, %v40_v35  ;;  %v2878_v48 = vld [vmem:[%s3200_s5] ss:$0 sm:$0xff] }
   0x7   :  { %2458 = vmatpush3.bf16.msra.mxu1 %v2819_v28 }
   0x8   :  { %2455 = vmatpush3.bf16.msra.mxu0 %v2788_v8  ;;  %v46_v9 = vld [vmem:[#allocation2] sm:$0xff]  ;;  %2459 = vmatprep.subr.bf16.mxu1 %v2707_v0 }
   0x9   :  { %2468 = vmatprep.subr.bf16.mxu0 %v2707_v0  ;;  %v47_v24 = vld [vmem:[#allocation3] sm:$0xff] }
   0xb   :  { %2199 = vmatmul.mubr.msk.f32.vlgmr.msra.gmra.mrb[0].mxu0 %vm43_vm0, %v46_v9  ;;  %2461 = vmatpush3.bf16.msra.mxu1 %v2825_v30 }
   0xc   :  { %2470 = vmatpush3.bf16.msra.mxu0 %v2775_v5  ;;  %2228 = vmatprep.mubr.msk.f32.mxu0 %vm2708_vm1, %v2709_v4 }
   0xd   :  { %2471 = vmatprep.subr.bf16.mxu0 %v2707_v0  ;;  %2462 = vmatprep.subr.bf16.mxu1 %v2707_v0 }
   0xf   :  { %2464 = vmatpush3.bf16.msra.mxu1 %v2835_v34 }
  0x10   :  { %2473 = vmatpush3.bf16.msra.mxu0 %v2788_v8  ;;  %2465 = vmatprep.subr.bf16.mxu1 %v2707_v0 }
  0x11   :  { %2474 = vmatprep.subr.bf16.mxu0 %v2707_v0 }
  0x13   :  { %2467 = vmatpush3.bf16.msra.mxu1 %v2846_v37 }
  0x14   :  { %2486 = vmatprep.subr.bf16.mxu1 %v2707_v0 }
  0x75   :  { %v2800_v10 = vpop.permute.xlu0 %134 }
  0xde   :  { %v118_v11 = vpop.f32.mrb[0].mxu0 }
  0xdf   :  { %v137_v12 = vadd.f32 %v2800_v10, %v118_v11  ;;  %v2200_v13 = vpop.f32.mrb[1].mxu0  ;;  %v122_v15 = vadd.f32 %v118_v11, %v48_v14 }
  0xe1   :  { %139 = vrot.lane.b32.xlu0 %v137_v12, %s2710_s15  ;;  %v2017_v16 = vmul.f32 -1.442695, %v122_v15 }
  0xe3   :  { %2610 = vpow2.f32 %v2017_v16 }
  0xe5   :  { %155 = vrot.lane.b32.xlu0 %v46_v9, %s2711_s2 }
  0xe9   :  { %166 = vrot.lane.b32.xlu0 %v47_v24, %s2711_s2 }
  0xed   :  { %v2611_v17 = vpop.eup %2610 }
  0xee   :  { %v126_v18 = vadd.f32 1.0, %v2611_v17 }
  0xf0   :  { %2612 = vrcp.f32 %v126_v18 }
  0xfa   :  { %v2613_v19 = vpop.eup %2612 }
  0xfb   :  { %v149_v39 = vsub.f32 1.0, %v2613_v19 }
 0x153   :  { %v140_v20 = vpop.permute.xlu0 %139 }
 0x154   :  { %v142_v21 = vmul.f32 %v2613_v19, %v140_v20 }
 0x156   :  { %144 = vrot.lane.b32.xlu1 %v142_v21, %s2710_s15 }
 0x157   :  { %v156_v38 = vpop.permute.xlu0 %155 }
 0x158   :  { %v158_v41 = vmul.f32 %v2613_v19, %v156_v38 }
 0x15b   :  { %v2852_v44 = vpop.permute.xlu0 %166 }
 0x1c8   :  { %v145_v22 = vpop.permute.xlu1 %144 }
 0x1c9   :  { %v147_v23 = vadd.f32 %v145_v22, %v48_v14 }
 0x1cb   :  { %2614 = vtanh.f32 %v147_v23 }
 0x1d5   :  { %v2615_v33 = vpop.eup %2614 }
 0x1d6   :  { %151 = vrot.lane.b32.xlu1 %v2615_v33, %s2712_s29 }
 0x248   :  { %v152_v40 = vpop.permute.xlu1 %151 }
 0x249   :  { %v154_v42 = vmul.f32 %v152_v40, %v149_v39 }
 0x24b   :  { %v159_v43 = vadd.f32 %v158_v41, %v154_v42 }
 0x24d   :  { %161 = vrot.lane.b32.xlu1 %v159_v43, %s2712_s29 }
 0x2bf   :  { %v162_v45 = vpop.permute.xlu1 %161 }
 0x2c0   :  { %164 = vst.msk [vmem:[#allocation2] sm:$0xff] %vm43_vm0, %v162_v45  ;;  %v169_v46 = vsel %vm43_vm0, %v162_v45, %v2852_v44 }
 0x2c1   :  { %2218 = vmatmul.mubr.msk.f32.vlgmr.msra.gmra.mrb[0].mxu1 %vm176_vm2, %v169_v46 }
 0x2c2   :  { %2488 = vmatpush3.bf16.msra.mxu1 %v2775_v5  ;;  %2258 = vmatprep.mubr.msk.f32.mxu1 %vm2708_vm1, %v2709_v4 }
 0x2c3   :  { %2489 = vmatprep.subr.bf16.mxu1 %v2707_v0 }
 0x2c6   :  { %2491 = vmatpush3.bf16.msra.mxu1 %v2788_v8 }
 0x2c7   :  { %v281_v47 = vld [vmem:[#allocation2] sm:$0xff]  ;;  %2492 = vmatprep.subr.bf16.mxu1 %v2707_v0 }
 0x2c8   :  { %2229 = vmatmul.mubr.msk.f32.vlgmr.msra.gmra.mrb[2].mxu0 %vm43_vm0, %v281_v47 }
 0x2c9   :  { %2476 = vmatpush3.bf16.msra.mxu0 %v2819_v28  ;;  %2247 = vmatprep.mubr.msk.f32.mxu0 %vm2708_vm1, %v2709_v4 }
 0x2ca   :  { %2477 = vmatprep.subr.bf16.mxu0 %v2707_v0 }
 0x2cd   :  { %2479 = vmatpush3.bf16.msra.mxu0 %v2825_v30 }
 0x2ce   :  { %2480 = vmatprep.subr.bf16.mxu0 %v2707_v0 }
 0x2d1   :  { %2482 = vmatpush3.bf16.msra.mxu0 %v2835_v34 }
 0x2d2   :  { %2483 = vmatprep.subr.bf16.mxu0 %v2707_v0 }
 0x2d5   :  { %2485 = vmatpush3.bf16.msra.mxu0 %v2846_v37 }
 0x2d6   :  { %2504 = vmatprep.subr.bf16.mxu0 %v2707_v0 }
 0x394   :  { %v246_v49 = vpop.f32.mrb[0].mxu1 }
 0x395   :  { %v247_v50 = vadd.f32 %v2878_v48, %v246_v49  ;;  %v2219_v51 = vpop.f32.mrb[1].mxu1 }
 0x397   :  { %257 = vrot.lane.b32.xlu1 %v247_v50, %s2711_s2  ;;  %v2021_v55 = vmul.f32 -1.442695, %v247_v50 }
 0x399   :  { %2616 = vpow2.f32 %v2021_v55 }
 0x39b   :  { %v354_v52 = vpop.f32.mrb[2].mxu0 }
 0x39c   :  { %v365_v53 = vadd.f32 %v354_v52, %v2800_v10  ;;  %v2230_v54 = vpop.f32.mrb[3].mxu0  ;;  %v358_v57 = vadd.f32 %v2022_v56, %v354_v52 }
 0x39e   :  { %367 = vrot.lane.b32.xlu1 %v365_v53, %s2710_s15  ;;  %v2024_v58 = vmul.f32 -1.442695, %v358_v57 }
 0x3a0   :  { %2618 = vpow2.f32 %v2024_v58 }
 0x3a3   :  { %v2617_v59 = vpop.eup %2616 }
 0x3a4   :  { %v253_v60 = vadd.f32 1.0, %v2617_v59 }
 0x3a6   :  { %2620 = vrcp.f32 %v253_v60 }
 0x3aa   :  { %v2619_v61 = vpop.eup %2618 }
 0x3ab   :  { %v362_v62 = vadd.f32 1.0, %v2619_v61 }
 0x3ad   :  { %2622 = vrcp.f32 %v362_v62 }
 0x3b0   :  { %v2621_v63 = vpop.eup %2620 }
 0x3b1   :  { %v267_v16 = vsub.f32 1.0, %v2621_v63  ;;  %v273_v18 = vmul.f32 %v2621_v63, %v2852_v44  ;;  %v2027_v44 = vld [vmem:[%s3198_s0 + $0x10] sm:$0xff] }
 0x3b7   :  { %v2623_v3 = vpop.eup %2622 }
 0x3b8   :  { %v377_v23 = vsub.f32 1.0, %v2623_v3 }
 0x409   :  { %v258_v1 = vpop.permute.xlu1 %257 }
 0x40a   :  { %v260_v2 = vmul.f32 %v2621_v63, %v258_v1 }
 0x40c   :  { %262 = vrot.lane.b32.xlu0 %v260_v2, %s2710_s15 }
 0x410   :  { %v368_v6 = vpop.permute.xlu1 %367 }
 0x411   :  { %v370_v7 = vmul.f32 %v2623_v3, %v368_v6 }
 0x413   :  { %372 = vrot.lane.b32.xlu0 %v370_v7, %s2710_s15 }
 0x47e   :  { %v263_v9 = vpop.permute.xlu0 %262 }
 0x47f   :  { %v265_v11 = vadd.f32 %v263_v9, %v247_v50 }
 0x481   :  { %2624 = vtanh.f32 %v265_v11 }
 0x485   :  { %v373_v12 = vpop.permute.xlu0 %372 }
 0x486   :  { %v375_v13 = vadd.f32 %v2022_v56, %v373_v12 }
 0x488   :  { %2626 = vtanh.f32 %v375_v13 }
 0x48b   :  { %v2625_v14 = vpop.eup %2624 }
 0x48c   :  { %269 = vrot.lane.b32.xlu1 %v2625_v14, %s2712_s29 }
 0x492   :  { %v2627_v15 = vpop.eup %2626 }
 0x493   :  { %379 = vrot.lane.b32.xlu1 %v2627_v15, %s2712_s29 }
 0x4fe   :  { %v270_v17 = vpop.permute.xlu1 %269 }
 0x4ff   :  { %v272_v19 = vmul.f32 %v270_v17, %v267_v16 }
 0x501   :  { %v274_v20 = vadd.f32 %v273_v18, %v272_v19 }
 0x503   :  { %276 = vrot.lane.b32.xlu0 %v274_v20, %s2712_s29 }
 0x505   :  { %v380_v22 = vpop.permute.xlu1 %379 }
 0x506   :  { %v382_v25 = vmul.f32 %v380_v22, %v377_v23 }
 0x507   :  { %383 = vrot.lane.b32.xlu0 %v281_v47, %s2711_s2 }
 0x575   :  { %v277_v21 = vpop.permute.xlu0 %276 }
 0x576   :  { %279 = vst.msk [vmem:[#allocation3] sm:$0xff] %vm43_vm0, %v277_v21  ;;  %280 = vst.msk [vmem:[#allocation4] sm:$0xff] %vm43_vm0, %v277_v21 }
 0x579   :  { %v384_v24 = vpop.permute.xlu0 %383 }
 0x57a   :  { %v386_v26 = vmul.f32 %v2623_v3, %v384_v24 }
 0x57c   :  { %v387_v27 = vadd.f32 %v386_v26, %v382_v25 }
 0x57d   :  { %v282_v29 = vld [vmem:[#allocation3] sm:$0xff] }
 0x57e   :  { %394 = vrot.lane.b32.xlu0 %v282_v29, %s2711_s2  ;;  %389 = vrot.lane.b32.xlu1 %v387_v27, %s2712_s29 }
 0x5f0   :  { %v390_v31 = vpop.permute.xlu1 %389  ;;  %v395_v32 = vpop.permute.xlu0 %394 }
 0x5f1   :  { %392 = vst.msk [vmem:[#allocation2] sm:$0xff] %vm43_vm0, %v390_v31  ;;  %v397_v33 = vsel %vm43_vm0, %v390_v31, %v395_v32  ;;  %v2032_v31 = vld [vmem:[%s3198_s0 + $0x18] sm:$0xff] }
 0x5f2   :  { %2248 = vmatmul.mubr.msk.f32.vlgmr.msra.gmra.mrb[4].mxu0 %vm176_vm2, %v397_v33 }
 0x5f3   :  { %2506 = vmatpush3.bf16.msra.mxu0 %v2775_v5  ;;  %2288 = vmatprep.mubr.msk.f32.mxu0 %vm2708_vm1, %v2709_v4 }
 0x5f4   :  { %2507 = vmatprep.subr.bf16.mxu0 %v2707_v0 }
 0x5f7   :  { %2509 = vmatpush3.bf16.msra.mxu0 %v2788_v8 }
 0x5f8   :  { %v503_v35 = vld [vmem:[#allocation2] sm:$0xff]  ;;  %2510 = vmatprep.subr.bf16.mxu0 %v2707_v0 }
 0x5f9   :  { %2259 = vmatmul.mubr.msk.f32.vlgmr.msra.gmra.mrb[2].mxu1 %vm43_vm0, %v503_v35 }
 0x5fa   :  { %2494 = vmatpush3.bf16.msra.mxu1 %v2819_v28  ;;  %2277 = vmatprep.mubr.msk.f32.mxu1 %vm2708_vm1, %v2709_v4 }
 0x5fb   :  { %2495 = vmatprep.subr.bf16.mxu1 %v2707_v0 }
 0x5fe   :  { %2497 = vmatpush3.bf16.msra.mxu1 %v2825_v30 }
 0x5ff   :  { %2498 = vmatprep.subr.bf16.mxu1 %v2707_v0 }
 0x602   :  { %2500 = vmatpush3.bf16.msra.mxu1 %v2835_v34 }
 0x603   :  { %2501 = vmatprep.subr.bf16.mxu1 %v2707_v0 }
 0x606   :  { %2503 = vmatpush3.bf16.msra.mxu1 %v2846_v37 }
 0x607   :  { %2522 = vmatprep.subr.bf16.mxu1 %v2707_v0 }
 0x6c5   :  { %v467_v36 = vpop.f32.mrb[4].mxu0 }
 0x6c6   :  { %v468_v38 = vadd.f32 %v2878_v48, %v467_v36  ;;  %v2249_v39 = vpop.f32.mrb[5].mxu0 }
 0x6c8   :  { %478 = vrot.lane.b32.xlu1 %v468_v38, %s2711_s2  ;;  %v2026_v43 = vmul.f32 -1.442695, %v468_v38 }
 0x6ca   :  { %2628 = vpow2.f32 %v2026_v43 }
 0x6cc   :  { %v576_v40 = vpop.f32.mrb[2].mxu1 }
 0x6cd   :  { %v587_v41 = vadd.f32 %v576_v40, %v2800_v10  ;;  %v2260_v42 = vpop.f32.mrb[3].mxu1  ;;  %v580_v45 = vadd.f32 %v2027_v44, %v576_v40 }
 0x6cf   :  { %589 = vrot.lane.b32.xlu1 %v587_v41, %s2710_s15  ;;  %v2029_v46 = vmul.f32 -1.442695, %v580_v45 }
 0x6d1   :  { %2630 = vpow2.f32 %v2029_v46 }
 0x6d4   :  { %v2629_v47 = vpop.eup %2628 }
 0x6d5   :  { %v474_v49 = vadd.f32 1.0, %v2629_v47 }
 0x6d7   :  { %2632 = vrcp.f32 %v474_v49 }
 0x6db   :  { %v2631_v50 = vpop.eup %2630 }
 0x6dc   :  { %v584_v51 = vadd.f32 1.0, %v2631_v50 }
 0x6de   :  { %2634 = vrcp.f32 %v584_v51 }
 0x6e1   :  { %v2633_v52 = vpop.eup %2632 }
 0x6e2   :  { %v488_v1 = vsub.f32 1.0, %v2633_v52  ;;  %v494_v3 = vmul.f32 %v2633_v52, %v395_v32 }
 0x6e8   :  { %v2635_v55 = vpop.eup %2634 }
 0x6e9   :  { %v599_v12 = vsub.f32 1.0, %v2635_v55 }
 0x73a   :  { %v479_v53 = vpop.permute.xlu1 %478 }
 0x73b   :  { %v481_v54 = vmul.f32 %v2633_v52, %v479_v53 }
 0x73d   :  { %483 = vrot.lane.b32.xlu0 %v481_v54, %s2710_s15 }
 0x741   :  { %v590_v56 = vpop.permute.xlu1 %589 }
 0x742   :  { %v592_v57 = vmul.f32 %v2635_v55, %v590_v56 }
 0x744   :  { %594 = vrot.lane.b32.xlu0 %v592_v57, %s2710_s15 }
 0x7af   :  { %v484_v58 = vpop.permute.xlu0 %483 }
 0x7b0   :  { %v486_v59 = vadd.f32 %v484_v58, %v468_v38 }
 0x7b2   :  { %2636 = vtanh.f32 %v486_v59 }
 0x7b6   :  { %v595_v60 = vpop.permute.xlu0 %594 }
 0x7b7   :  { %v597_v61 = vadd.f32 %v2027_v44, %v595_v60 }
 0x7b9   :  { %2638 = vtanh.f32 %v597_v61 }
 0x7bc   :  { %v2637_v62 = vpop.eup %2636 }
 0x7bd   :  { %490 = vrot.lane.b32.xlu1 %v2637_v62, %s2712_s29 }
 0x7c3   :  { %v2639_v63 = vpop.eup %2638 }
 0x7c4   :  { %601 = vrot.lane.b32.xlu1 %v2639_v63, %s2712_s29 }
 0x82f   :  { %v491_v2 = vpop.permute.xlu1 %490 }
 0x830   :  { %v493_v6 = vmul.f32 %v491_v2, %v488_v1 }
 0x832   :  { %v495_v7 = vadd.f32 %v494_v3, %v493_v6 }
 0x834   :  { %497 = vrot.lane.b32.xlu0 %v495_v7, %s2712_s29 }
 0x836   :  { %v602_v11 = vpop.permute.xlu1 %601 }
 0x837   :  { %v604_v14 = vmul.f32 %v602_v11, %v599_v12 }
 0x838   :  { %605 = vrot.lane.b32.xlu0 %v503_v35, %s2711_s2 }
 0x8a6   :  { %v498_v9 = vpop.permute.xlu0 %497 }
 0x8a7   :  { %500 = vst.msk [vmem:[#allocation3] sm:$0xff] %vm43_vm0, %v498_v9  ;;  %502 = vst.msk [vmem:[#allocation4 + $0x8] sm:$0xff] %vm43_vm0, %v498_v9 }
 0x8aa   :  { %v606_v13 = vpop.permute.xlu0 %605 }
 0x8ab   :  { %v608_v15 = vmul.f32 %v2635_v55, %v606_v13 }
 0x8ad   :  { %v609_v16 = vadd.f32 %v608_v15, %v604_v14 }
 0x8ae   :  { %v504_v17 = vld [vmem:[#allocation3] sm:$0xff] }
 0x8af   :  { %616 = vrot.lane.b32.xlu0 %v504_v17, %s2711_s2  ;;  %611 = vrot.lane.b32.xlu1 %v609_v16, %s2712_s29 }
 0x921   :  { %v612_v18 = vpop.permute.xlu1 %611  ;;  %v617_v19 = vpop.permute.xlu0 %616 }
 0x922   :  { %614 = vst.msk [vmem:[#allocation2] sm:$0xff] %vm43_vm0, %v612_v18  ;;  %v619_v20 = vsel %vm43_vm0, %v612_v18, %v617_v19  ;;  %v2037_v18 = vld [vmem:[%s3198_s0 + $0x20] sm:$0xff] }
 0x923   :  { %2278 = vmatmul.mubr.msk.f32.vlgmr.msra.gmra.mrb[4].mxu1 %vm176_vm2, %v619_v20 }
 0x924   :  { %2524 = vmatpush3.bf16.msra.mxu1 %v2775_v5  ;;  %2318 = vmatprep.mubr.msk.f32.mxu1 %vm2708_vm1, %v2709_v4 }
 0x925   :  { %2525 = vmatprep.subr.bf16.mxu1 %v2707_v0 }
 0x928   :  { %2527 = vmatpush3.bf16.msra.mxu1 %v2788_v8 }
 0x929   :  { %v725_v21 = vld [vmem:[#allocation2] sm:$0xff]  ;;  %2528 = vmatprep.subr.bf16.mxu1 %v2707_v0 }
 0x92a   :  { %2289 = vmatmul.mubr.msk.f32.vlgmr.msra.gmra.mrb[6].mxu0 %vm43_vm0, %v725_v21 }
 0x92b   :  { %2512 = vmatpush3.bf16.msra.mxu0 %v2819_v28  ;;  %2307 = vmatprep.mubr.msk.f32.mxu0 %vm2708_vm1, %v2709_v4 }
 0x92c   :  { %2513 = vmatprep.subr.bf16.mxu0 %v2707_v0 }
 0x92f   :  { %2515 = vmatpush3.bf16.msra.mxu0 %v2825_v30 }
 0x930   :  { %2516 = vmatprep.subr.bf16.mxu0 %v2707_v0 }
 0x933   :  { %2518 = vmatpush3.bf16.msra.mxu0 %v2835_v34 }
 0x934   :  { %2519 = vmatprep.subr.bf16.mxu0 %v2707_v0 }
 0x937   :  { %2521 = vmatpush3.bf16.msra.mxu0 %v2846_v37 }
 0x938   :  { %2540 = vmatprep.subr.bf16.mxu0 %v2707_v0 }
 0x9f6   :  { %v689_v22 = vpop.f32.mrb[4].mxu1 }
 0x9f7   :  { %v690_v23 = vadd.f32 %v2878_v48, %v689_v22  ;;  %v2279_v24 = vpop.f32.mrb[5].mxu1 }
 0x9f9   :  { %700 = vrot.lane.b32.xlu1 %v690_v23, %s2711_s2  ;;  %v2031_v29 = vmul.f32 -1.442695, %v690_v23 }
 0x9fb   :  { %2640 = vpow2.f32 %v2031_v29 }
 0x9fd   :  { %v798_v25 = vpop.f32.mrb[6].mxu0 }
 0x9fe   :  { %v809_v26 = vadd.f32 %v798_v25, %v2800_v10  ;;  %v2290_v27 = vpop.f32.mrb[7].mxu0  ;;  %v802_v32 = vadd.f32 %v2032_v31, %v798_v25 }
 0xa00   :  { %811 = vrot.lane.b32.xlu1 %v809_v26, %s2710_s15  ;;  %v2034_v33 = vmul.f32 -1.442695, %v802_v32 }
 0xa02   :  { %2642 = vpow2.f32 %v2034_v33 }
 0xa05   :  { %v2641_v35 = vpop.eup %2640 }
 0xa06   :  { %v696_v36 = vadd.f32 1.0, %v2641_v35 }
 0xa08   :  { %2644 = vrcp.f32 %v696_v36 }
 0xa0c   :  { %v2643_v38 = vpop.eup %2642 }
 0xa0d   :  { %v806_v39 = vadd.f32 1.0, %v2643_v38 }
 0xa0f   :  { %2646 = vrcp.f32 %v806_v39 }
 0xa12   :  { %v2645_v40 = vpop.eup %2644 }
 0xa13   :  { %v710_v53 = vsub.f32 1.0, %v2645_v40  ;;  %v716_v55 = vmul.f32 %v2645_v40, %v617_v19 }
 0xa19   :  { %v2647_v43 = vpop.eup %2646 }
 0xa1a   :  { %v821_v60 = vsub.f32 1.0, %v2647_v43 }
 0xa6b   :  { %v701_v41 = vpop.permute.xlu1 %700 }
 0xa6c   :  { %v703_v42 = vmul.f32 %v2645_v40, %v701_v41 }
 0xa6e   :  { %705 = vrot.lane.b32.xlu0 %v703_v42, %s2710_s15 }
 0xa72   :  { %v812_v44 = vpop.permute.xlu1 %811 }
 0xa73   :  { %v814_v45 = vmul.f32 %v2647_v43, %v812_v44 }
 0xa75   :  { %816 = vrot.lane.b32.xlu0 %v814_v45, %s2710_s15 }
 0xae0   :  { %v706_v46 = vpop.permute.xlu0 %705 }
 0xae1   :  { %v708_v47 = vadd.f32 %v706_v46, %v690_v23 }
 0xae3   :  { %2648 = vtanh.f32 %v708_v47 }
 0xae7   :  { %v817_v49 = vpop.permute.xlu0 %816 }
 0xae8   :  { %v819_v50 = vadd.f32 %v2032_v31, %v817_v49 }
 0xaea   :  { %2650 = vtanh.f32 %v819_v50 }
 0xaed   :  { %v2649_v51 = vpop.eup %2648 }
 0xaee   :  { %712 = vrot.lane.b32.xlu1 %v2649_v51, %s2712_s29 }
 0xaf4   :  { %v2651_v52 = vpop.eup %2650 }
 0xaf5   :  { %823 = vrot.lane.b32.xlu1 %v2651_v52, %s2712_s29 }
 0xb60   :  { %v713_v54 = vpop.permute.xlu1 %712 }
 0xb61   :  { %v715_v56 = vmul.f32 %v713_v54, %v710_v53 }
 0xb63   :  { %v717_v57 = vadd.f32 %v716_v55, %v715_v56 }
 0xb65   :  { %719 = vrot.lane.b32.xlu0 %v717_v57, %s2712_s29 }
 0xb67   :  { %v824_v59 = vpop.permute.xlu1 %823 }
 0xb68   :  { %v826_v62 = vmul.f32 %v824_v59, %v821_v60 }
 0xb69   :  { %827 = vrot.lane.b32.xlu0 %v725_v21, %s2711_s2 }
 0xbd7   :  { %v720_v58 = vpop.permute.xlu0 %719 }
 0xbd8   :  { %722 = vst.msk [vmem:[#allocation3] sm:$0xff] %vm43_vm0, %v720_v58  ;;  %724 = vst.msk [vmem:[#allocation4 + $0x10] sm:$0xff] %vm43_vm0, %v720_v58 }
 0xbdb   :  { %v828_v61 = vpop.permute.xlu0 %827 }
 0xbdc   :  { %v830_v63 = vmul.f32 %v2647_v43, %v828_v61 }
 0xbde   :  { %v831_v1 = vadd.f32 %v830_v63, %v826_v62 }
 0xbdf   :  { %v726_v2 = vld [vmem:[#allocation3] sm:$0xff] }
 0xbe0   :  { %838 = vrot.lane.b32.xlu0 %v726_v2, %s2711_s2  ;;  %833 = vrot.lane.b32.xlu1 %v831_v1, %s2712_s29 }
 0xc52   :  { %v834_v3 = vpop.permute.xlu1 %833  ;;  %v839_v6 = vpop.permute.xlu0 %838 }
 0xc53   :  { %836 = vst.msk [vmem:[#allocation2] sm:$0xff] %vm43_vm0, %v834_v3  ;;  %v841_v7 = vsel %vm43_vm0, %v834_v3, %v839_v6  ;;  %v2042_v3 = vld [vmem:[%s3198_s0 + $0x28] sm:$0xff] }
 0xc54   :  { %2308 = vmatmul.mubr.msk.f32.vlgmr.msra.gmra.mrb[8].mxu0 %vm176_vm2, %v841_v7 }
 0xc55   :  { %2542 = vmatpush3.bf16.msra.mxu0 %v2775_v5  ;;  %2348 = vmatprep.mubr.msk.f32.mxu0 %vm2708_vm1, %v2709_v4 }
 0xc56   :  { %2543 = vmatprep.subr.bf16.mxu0 %v2707_v0 }
 0xc59   :  { %2545 = vmatpush3.bf16.msra.mxu0 %v2788_v8 }
 0xc5a   :  { %v947_v9 = vld [vmem:[#allocation2] sm:$0xff]  ;;  %2546 = vmatprep.subr.bf16.mxu0 %v2707_v0 }
 0xc5b   :  { %2319 = vmatmul.mubr.msk.f32.vlgmr.msra.gmra.mrb[6].mxu1 %vm43_vm0, %v947_v9 }
 0xc5c   :  { %2530 = vmatpush3.bf16.msra.mxu1 %v2819_v28  ;;  %2337 = vmatprep.mubr.msk.f32.mxu1 %vm2708_vm1, %v2709_v4 }
 0xc5d   :  { %2531 = vmatprep.subr.bf16.mxu1 %v2707_v0 }
 0xc60   :  { %2533 = vmatpush3.bf16.msra.mxu1 %v2825_v30 }
 0xc61   :  { %2534 = vmatprep.subr.bf16.mxu1 %v2707_v0 }
 0xc64   :  { %2536 = vmatpush3.bf16.msra.mxu1 %v2835_v34 }
 0xc65   :  { %2537 = vmatprep.subr.bf16.mxu1 %v2707_v0 }
 0xc68   :  { %2539 = vmatpush3.bf16.msra.mxu1 %v2846_v37 }
 0xc69   :  { %2558 = vmatprep.subr.bf16.mxu1 %v2707_v0 }
 0xd27   :  { %v911_v11 = vpop.f32.mrb[8].mxu0 }
 0xd28   :  { %v912_v12 = vadd.f32 %v2878_v48, %v911_v11  ;;  %v2309_v13 = vpop.f32.mrb[9].mxu0 }
 0xd2a   :  { %922 = vrot.lane.b32.xlu1 %v912_v12, %s2711_s2  ;;  %v2036_v17 = vmul.f32 -1.442695, %v912_v12 }
 0xd2c   :  { %2652 = vpow2.f32 %v2036_v17 }
 0xd2e   :  { %v1020_v14 = vpop.f32.mrb[6].mxu1 }
 0xd2f   :  { %v1031_v15 = vadd.f32 %v1020_v14, %v2800_v10  ;;  %v2320_v16 = vpop.f32.mrb[7].mxu1  ;;  %v1024_v19 = vadd.f32 %v2037_v18, %v1020_v14 }
 0xd31   :  { %1033 = vrot.lane.b32.xlu1 %v1031_v15, %s2710_s15  ;;  %v2039_v20 = vmul.f32 -1.442695, %v1024_v19 }
 0xd33   :  { %2654 = vpow2.f32 %v2039_v20 }
 0xd36   :  { %v2653_v21 = vpop.eup %2652 }
 0xd37   :  { %v918_v22 = vadd.f32 1.0, %v2653_v21 }
 0xd39   :  { %2656 = vrcp.f32 %v918_v22 }
 0xd3d   :  { %v2655_v23 = vpop.eup %2654 }
 0xd3e   :  { %v1028_v24 = vadd.f32 1.0, %v2655_v23 }
 0xd40   :  { %2658 = vrcp.f32 %v1028_v24 }
 0xd43   :  { %v2657_v25 = vpop.eup %2656 }
 0xd44   :  { %v932_v41 = vsub.f32 1.0, %v2657_v25  ;;  %v938_v43 = vmul.f32 %v2657_v25, %v839_v6 }
 0xd4a   :  { %v2659_v29 = vpop.eup %2658 }
 0xd4b   :  { %v1043_v49 = vsub.f32 1.0, %v2659_v29 }
 0xd9c   :  { %v923_v26 = vpop.permute.xlu1 %922 }
 0xd9d   :  { %v925_v27 = vmul.f32 %v2657_v25, %v923_v26 }
 0xd9f   :  { %927 = vrot.lane.b32.xlu0 %v925_v27, %s2710_s15 }
 0xda3   :  { %v1034_v31 = vpop.permute.xlu1 %1033 }
 0xda4   :  { %v1036_v32 = vmul.f32 %v2659_v29, %v1034_v31 }
 0xda6   :  { %1038 = vrot.lane.b32.xlu0 %v1036_v32, %s2710_s15 }
 0xe11   :  { %v928_v33 = vpop.permute.xlu0 %927 }
 0xe12   :  { %v930_v35 = vadd.f32 %v928_v33, %v912_v12 }
 0xe14   :  { %2660 = vtanh.f32 %v930_v35 }
 0xe18   :  { %v1039_v36 = vpop.permute.xlu0 %1038 }
 0xe19   :  { %v1041_v38 = vadd.f32 %v2037_v18, %v1039_v36 }
 0xe1b   :  { %2662 = vtanh.f32 %v1041_v38 }
 0xe1e   :  { %v2661_v39 = vpop.eup %2660 }
 0xe1f   :  { %934 = vrot.lane.b32.xlu1 %v2661_v39, %s2712_s29 }
 0xe25   :  { %v2663_v40 = vpop.eup %2662 }
 0xe26   :  { %1045 = vrot.lane.b32.xlu1 %v2663_v40, %s2712_s29 }
 0xe91   :  { %v935_v42 = vpop.permute.xlu1 %934 }
 0xe92   :  { %v937_v44 = vmul.f32 %v935_v42, %v932_v41 }
 0xe94   :  { %v939_v45 = vadd.f32 %v938_v43, %v937_v44 }
 0xe96   :  { %941 = vrot.lane.b32.xlu0 %v939_v45, %s2712_s29 }
 0xe98   :  { %v1046_v47 = vpop.permute.xlu1 %1045 }
 0xe99   :  { %v1048_v51 = vmul.f32 %v1046_v47, %v1043_v49 }
 0xe9a   :  { %1049 = vrot.lane.b32.xlu0 %v947_v9, %s2711_s2 }
 0xf08   :  { %v942_v46 = vpop.permute.xlu0 %941 }
 0xf09   :  { %944 = vst.msk [vmem:[#allocation3] sm:$0xff] %vm43_vm0, %v942_v46  ;;  %946 = vst.msk [vmem:[#allocation4 + $0x18] sm:$0xff] %vm43_vm0, %v942_v46 }
 0xf0c   :  { %v1050_v50 = vpop.permute.xlu0 %1049 }
 0xf0d   :  { %v1052_v52 = vmul.f32 %v2659_v29, %v1050_v50 }
 0xf0f   :  { %v1053_v53 = vadd.f32 %v1052_v52, %v1048_v51 }
 0xf10   :  { %v948_v54 = vld [vmem:[#allocation3] sm:$0xff] }
 0xf11   :  { %1060 = vrot.lane.b32.xlu0 %v948_v54, %s2711_s2  ;;  %1055 = vrot.lane.b32.xlu1 %v1053_v53, %s2712_s29  ;;  %v2047_v53 = vld [vmem:[%s3198_s0 + $0x30] sm:$0xff] }
 0xf83   :  { %v1056_v55 = vpop.permute.xlu1 %1055  ;;  %v1061_v56 = vpop.permute.xlu0 %1060 }
 0xf84   :  { %1058 = vst.msk [vmem:[#allocation2] sm:$0xff] %vm43_vm0, %v1056_v55  ;;  %v1063_v57 = vsel %vm43_vm0, %v1056_v55, %v1061_v56 }
 0xf85   :  { %2338 = vmatmul.mubr.msk.f32.vlgmr.msra.gmra.mrb[8].mxu1 %vm176_vm2, %v1063_v57 }
 0xf86   :  { %2560 = vmatpush3.bf16.msra.mxu1 %v2775_v5  ;;  %2378 = vmatprep.mubr.msk.f32.mxu1 %vm2708_vm1, %v2709_v4 }
 0xf87   :  { %2561 = vmatprep.subr.bf16.mxu1 %v2707_v0 }
 0xf8a   :  { %2563 = vmatpush3.bf16.msra.mxu1 %v2788_v8 }
 0xf8b   :  { %v1169_v58 = vld [vmem:[#allocation2] sm:$0xff]  ;;  %2564 = vmatprep.subr.bf16.mxu1 %v2707_v0 }
 0xf8c   :  { %2349 = vmatmul.mubr.msk.f32.vlgmr.msra.gmra.mrb[10].mxu0 %vm43_vm0, %v1169_v58 }
 0xf8d   :  { %2548 = vmatpush3.bf16.msra.mxu0 %v2819_v28  ;;  %2367 = vmatprep.mubr.msk.f32.mxu0 %vm2708_vm1, %v2709_v4 }
 0xf8e   :  { %2549 = vmatprep.subr.bf16.mxu0 %v2707_v0 }
 0xf91   :  { %2551 = vmatpush3.bf16.msra.mxu0 %v2825_v30 }
 0xf92   :  { %2552 = vmatprep.subr.bf16.mxu0 %v2707_v0 }
 0xf95   :  { %2554 = vmatpush3.bf16.msra.mxu0 %v2835_v34 }
 0xf96   :  { %2555 = vmatprep.subr.bf16.mxu0 %v2707_v0 }
 0xf99   :  { %2557 = vmatpush3.bf16.msra.mxu0 %v2846_v37 }
 0xf9a   :  { %2576 = vmatprep.subr.bf16.mxu0 %v2707_v0 }
0x1058   :  { %v1133_v59 = vpop.f32.mrb[8].mxu1 }
0x1059   :  { %v1134_v60 = vadd.f32 %v2878_v48, %v1133_v59  ;;  %v2339_v61 = vpop.f32.mrb[9].mxu1 }
0x105b   :  { %1144 = vrot.lane.b32.xlu1 %v1134_v60, %s2711_s2  ;;  %v2041_v2 = vmul.f32 -1.442695, %v1134_v60 }
0x105d   :  { %2664 = vpow2.f32 %v2041_v2 }
0x105f   :  { %v1242_v62 = vpop.f32.mrb[10].mxu0 }
0x1060   :  { %v1253_v63 = vadd.f32 %v1242_v62, %v2800_v10  ;;  %v2350_v1 = vpop.f32.mrb[11].mxu0  ;;  %v1246_v6 = vadd.f32 %v2042_v3, %v1242_v62 }
0x1062   :  { %1255 = vrot.lane.b32.xlu1 %v1253_v63, %s2710_s15  ;;  %v2044_v7 = vmul.f32 -1.442695, %v1246_v6 }
0x1064   :  { %2666 = vpow2.f32 %v2044_v7 }
0x1067   :  { %v2665_v9 = vpop.eup %2664 }
0x1068   :  { %v1140_v11 = vadd.f32 1.0, %v2665_v9 }
0x106a   :  { %2668 = vrcp.f32 %v1140_v11 }
0x106e   :  { %v2667_v12 = vpop.eup %2666 }
0x106f   :  { %v1250_v13 = vadd.f32 1.0, %v2667_v12 }
0x1071   :  { %2670 = vrcp.f32 %v1250_v13 }
0x1074   :  { %v2669_v14 = vpop.eup %2668 }
0x1075   :  { %v1154_v26 = vsub.f32 1.0, %v2669_v14  ;;  %v1160_v29 = vmul.f32 %v2669_v14, %v1061_v56 }
0x107b   :  { %v2671_v17 = vpop.eup %2670 }
0x107c   :  { %v1265_v36 = vsub.f32 1.0, %v2671_v17 }
0x10cd   :  { %v1145_v15 = vpop.permute.xlu1 %1144 }
0x10ce   :  { %v1147_v16 = vmul.f32 %v2669_v14, %v1145_v15 }
0x10d0   :  { %1149 = vrot.lane.b32.xlu0 %v1147_v16, %s2710_s15 }
0x10d4   :  { %v1256_v18 = vpop.permute.xlu1 %1255 }
0x10d5   :  { %v1258_v19 = vmul.f32 %v2671_v17, %v1256_v18 }
0x10d7   :  { %1260 = vrot.lane.b32.xlu0 %v1258_v19, %s2710_s15 }
0x1142   :  { %v1150_v20 = vpop.permute.xlu0 %1149 }
0x1143   :  { %v1152_v21 = vadd.f32 %v1150_v20, %v1134_v60 }
0x1145   :  { %2672 = vtanh.f32 %v1152_v21 }
0x1149   :  { %v1261_v22 = vpop.permute.xlu0 %1260 }
0x114a   :  { %v1263_v23 = vadd.f32 %v2042_v3, %v1261_v22 }
0x114c   :  { %2674 = vtanh.f32 %v1263_v23 }
0x114f   :  { %v2673_v24 = vpop.eup %2672 }
0x1150   :  { %1156 = vrot.lane.b32.xlu1 %v2673_v24, %s2712_s29 }
0x1156   :  { %v2675_v25 = vpop.eup %2674 }
0x1157   :  { %1267 = vrot.lane.b32.xlu1 %v2675_v25, %s2712_s29 }
0x11c2   :  { %v1157_v27 = vpop.permute.xlu1 %1156 }
0x11c3   :  { %v1159_v31 = vmul.f32 %v1157_v27, %v1154_v26 }
0x11c5   :  { %v1161_v32 = vadd.f32 %v1160_v29, %v1159_v31 }
0x11c7   :  { %1163 = vrot.lane.b32.xlu0 %v1161_v32, %s2712_s29 }
0x11c9   :  { %v1268_v35 = vpop.permute.xlu1 %1267 }
0x11ca   :  { %v1270_v39 = vmul.f32 %v1268_v35, %v1265_v36 }
0x11cb   :  { %1271 = vrot.lane.b32.xlu0 %v1169_v58, %s2711_s2 }
0x1239   :  { %v1164_v33 = vpop.permute.xlu0 %1163 }
0x123a   :  { %1166 = vst.msk [vmem:[#allocation3] sm:$0xff] %vm43_vm0, %v1164_v33  ;;  %1168 = vst.msk [vmem:[#allocation4 + $0x20] sm:$0xff] %vm43_vm0, %v1164_v33 }
0x123d   :  { %v1272_v38 = vpop.permute.xlu0 %1271 }
0x123e   :  { %v1274_v40 = vmul.f32 %v2671_v17, %v1272_v38 }
0x1240   :  { %v1275_v41 = vadd.f32 %v1274_v40, %v1270_v39 }
0x1241   :  { %v1170_v42 = vld [vmem:[#allocation3] sm:$0xff] }
0x1242   :  { %1282 = vrot.lane.b32.xlu0 %v1170_v42, %s2711_s2  ;;  %1277 = vrot.lane.b32.xlu1 %v1275_v41, %s2712_s29 }
0x12b4   :  { %v1278_v43 = vpop.permute.xlu1 %1277  ;;  %v1283_v44 = vpop.permute.xlu0 %1282 }
0x12b5   :  { %1280 = vst.msk [vmem:[#allocation2] sm:$0xff] %vm43_vm0, %v1278_v43  ;;  %v1285_v45 = vsel %vm43_vm0, %v1278_v43, %v1283_v44 }
0x12b6   :  { %2368 = vmatmul.mubr.msk.f32.vlgmr.msra.gmra.mrb[12].mxu0 %vm176_vm2, %v1285_v45 }
0x12b7   :  { %2578 = vmatpush3.bf16.msra.mxu0 %v2775_v5  ;;  %2408 = vmatprep.mubr.msk.f32.mxu0 %vm2708_vm1, %v2709_v4 }
0x12b8   :  { %2579 = vmatprep.subr.bf16.mxu0 %v2707_v0 }
0x12bb   :  { %2581 = vmatpush3.bf16.msra.mxu0 %v2788_v8 }
0x12bc   :  { %v1391_v46 = vld [vmem:[#allocation2] sm:$0xff]  ;;  %2582 = vmatprep.subr.bf16.mxu0 %v2707_v0 }
0x12bd   :  { %2379 = vmatmul.mubr.msk.f32.vlgmr.msra.gmra.mrb[10].mxu1 %vm43_vm0, %v1391_v46 }
0x12be   :  { %2566 = vmatpush3.bf16.msra.mxu1 %v2819_v28  ;;  %2397 = vmatprep.mubr.msk.f32.mxu1 %vm2708_vm1, %v2709_v4 }
0x12bf   :  { %2567 = vmatprep.subr.bf16.mxu1 %v2707_v0 }
0x12c2   :  { %2569 = vmatpush3.bf16.msra.mxu1 %v2825_v30 }
0x12c3   :  { %2570 = vmatprep.subr.bf16.mxu1 %v2707_v0 }
0x12c6   :  { %2572 = vmatpush3.bf16.msra.mxu1 %v2835_v34 }
0x12c7   :  { %2573 = vmatprep.subr.bf16.mxu1 %v2707_v0 }
0x12ca   :  { %2575 = vmatpush3.bf16.msra.mxu1 %v2846_v37 }
0x1389   :  { %v1355_v5 = vpop.f32.mrb[12].mxu0 }
0x138a   :  { %v1356_v8 = vadd.f32 %v2878_v48, %v1355_v5  ;;  %v2369_v47 = vpop.f32.mrb[13].mxu0 }
0x138c   :  { %1366 = vrot.lane.b32.xlu1 %v1356_v8, %s2711_s2  ;;  %v2046_v52 = vmul.f32 -1.442695, %v1356_v8 }
0x138e   :  { %2676 = vpow2.f32 %v2046_v52 }
0x1390   :  { %v1464_v49 = vpop.f32.mrb[10].mxu1 }
0x1391   :  { %v1475_v50 = vadd.f32 %v1464_v49, %v2800_v10  ;;  %v2380_v51 = vpop.f32.mrb[11].mxu1  ;;  %v1468_v54 = vadd.f32 %v2047_v53, %v1464_v49 }
0x1393   :  { %1477 = vrot.lane.b32.xlu1 %v1475_v50, %s2710_s15  ;;  %v2049_v55 = vmul.f32 -1.442695, %v1468_v54 }
0x1395   :  { %2678 = vpow2.f32 %v2049_v55 }
0x1398   :  { %v2677_v56 = vpop.eup %2676 }
0x1399   :  { %v1362_v57 = vadd.f32 1.0, %v2677_v56 }
0x139b   :  { %2680 = vrcp.f32 %v1362_v57 }
0x139f   :  { %v2679_v58 = vpop.eup %2678 }
0x13a0   :  { %v1472_v59 = vadd.f32 1.0, %v2679_v58 }
0x13a2   :  { %2682 = vrcp.f32 %v1472_v59 }
0x13a5   :  { %v2681_v60 = vpop.eup %2680 }
0x13a6   :  { %v1376_v13 = vsub.f32 1.0, %v2681_v60  ;;  %v1382_v15 = vmul.f32 %v2681_v60, %v1283_v44 }
0x13ac   :  { %v2683_v63 = vpop.eup %2682 }
0x13ad   :  { %v1487_v20 = vsub.f32 1.0, %v2683_v63 }
0x13fe   :  { %v1367_v61 = vpop.permute.xlu1 %1366 }
0x13ff   :  { %v1369_v62 = vmul.f32 %v2681_v60, %v1367_v61 }
0x1401   :  { %1371 = vrot.lane.b32.xlu0 %v1369_v62, %s2710_s15 }
0x1405   :  { %v1478_v1 = vpop.permute.xlu1 %1477 }
0x1406   :  { %v1480_v2 = vmul.f32 %v2683_v63, %v1478_v1 }
0x1408   :  { %1482 = vrot.lane.b32.xlu0 %v1480_v2, %s2710_s15 }
0x1473   :  { %v1372_v3 = vpop.permute.xlu0 %1371 }
0x1474   :  { %v1374_v6 = vadd.f32 %v1372_v3, %v1356_v8 }
0x1476   :  { %2684 = vtanh.f32 %v1374_v6  ;;  %v2713_v6 = vmov 0  }
0x1477   :  { %2609 = vset.pattern.permute.xlu0 %v2713_v6 }
0x147a   :  { %v1483_v7 = vpop.permute.xlu0 %1482 }
0x147b   :  { %v1485_v9 = vadd.f32 %v2047_v53, %v1483_v7 }
0x147d   :  { %2686 = vtanh.f32 %v1485_v9  ;;  %v2706_v9 = vld [vmem:[%s3200_s5] ss:$0 sm:$0xff] }
0x1480   :  { %v2685_v11 = vpop.eup %2684 }
0x1481   :  { %1378 = vrot.lane.b32.xlu1 %v2685_v11, %s2712_s29 }
0x1487   :  { %v2687_v12 = vpop.eup %2686 }
0x1488   :  { %1489 = vrot.lane.b32.xlu1 %v2687_v12, %s2712_s29 }
0x14f3   :  { %v1379_v14 = vpop.permute.xlu1 %1378 }
0x14f4   :  { %v1381_v16 = vmul.f32 %v1379_v14, %v1376_v13 }
0x14f6   :  { %v1383_v17 = vadd.f32 %v1382_v15, %v1381_v16  ;;  %v1863_v16 = vld [vmem:[%s3201_s6] sm:$0xff] }
0x14f8   :  { %1385 = vrot.lane.b32.xlu0 %v1383_v17, %s2712_s29  ;;  %v1864_v17 = vld [vmem:[%s3201_s6 + $0x8] sm:$0xff] }
0x14fa   :  { %v1490_v19 = vpop.permute.xlu1 %1489 }
0x14fb   :  { %v1492_v22 = vmul.f32 %v1490_v19, %v1487_v20 }
0x14fc   :  { %1493 = vrot.lane.b32.xlu0 %v1391_v46, %s2711_s2 }
0x156a   :  { %v1386_v18 = vpop.permute.xlu0 %1385 }
0x156b   :  { %1388 = vst.msk [vmem:[#allocation3] sm:$0xff] %vm43_vm0, %v1386_v18  ;;  %1390 = vst.msk [vmem:[#allocation4 + $0x28] sm:$0xff] %vm43_vm0, %v1386_v18  ;;  %v2594_v18 = vpack.c.bf16 %v1864_v17, %v1863_v16 }
0x156d   :  { %2595 = vmatprep.subr.bf16.mxu1 %v2594_v18 }
0x156e   :  { %v1494_v21 = vpop.permute.xlu0 %1493 }
0x156f   :  { %v1496_v23 = vmul.f32 %v2683_v63, %v1494_v21 }
0x1571   :  { %v1497_v24 = vadd.f32 %v1496_v23, %v1492_v22  ;;  %v1865_v22 = vld [vmem:[%s3201_s6 + $0x10] sm:$0xff]  ;;  %v1866_v23 = vld [vmem:[%s3201_s6 + $0x18] sm:$0xff] }
0x1572   :  { %v1392_v25 = vld [vmem:[#allocation3] sm:$0xff] }
0x1573   :  { %1504 = vrot.lane.b32.xlu0 %v1392_v25, %s2711_s2  ;;  %1499 = vrot.lane.b32.xlu1 %v1497_v24, %s2712_s29  ;;  %v1835_v24 = vld [vmem:[%s3202_s1] sm:$0xff]  ;;  %v2598_v25 = vpack.c.bf16 %v1866_v23, %v1865_v22 }
0x15e5   :  { %v1500_v26 = vpop.permute.xlu1 %1499  ;;  %v1505_v27 = vpop.permute.xlu0 %1504 }
0x15e6   :  { %1502 = vst.msk [vmem:[#allocation2] sm:$0xff] %vm43_vm0, %v1500_v26  ;;  %v1507_v29 = vsel %vm43_vm0, %v1500_v26, %v1505_v27 }
0x15e7   :  { %2398 = vmatmul.mubr.msk.f32.vlgmr.msra.gmra.mrb[12].mxu1 %vm176_vm2, %v1507_v29 }
0x15e8   :  { %2597 = vmatpush3.bf16.msra.mxu1 %v2594_v18 }
0x15e9   :  { %2599 = vmatprep.subr.bf16.mxu1 %v2598_v25 }
0x15ec   :  { %2601 = vmatpush3.bf16.msra.mxu1 %v2598_v25 }
0x15ed   :  { %v1613_v31 = vld [vmem:[#allocation2] sm:$0xff] }
0x15ee   :  { %2409 = vmatmul.mubr.msk.f32.vlgmr.msra.gmra.mrb[14].mxu0 %vm43_vm0, %v1613_v31 }
0x15ef   :  { %2584 = vmatpush3.bf16.msra.mxu0 %v2819_v28  ;;  %2427 = vmatprep.mubr.msk.f32.mxu0 %vm2708_vm1, %v2709_v4 }
0x15f0   :  { %2585 = vmatprep.subr.bf16.mxu0 %v2707_v0 }
0x15f3   :  { %2587 = vmatpush3.bf16.msra.mxu0 %v2825_v30 }
0x15f4   :  { %2588 = vmatprep.subr.bf16.mxu0 %v2707_v0 }
0x15f7   :  { %2590 = vmatpush3.bf16.msra.mxu0 %v2835_v34  ;;  %v2052_v34 = vld [vmem:[%s3198_s0 + $0x38] sm:$0xff] }
0x15f8   :  { %2591 = vmatprep.subr.bf16.mxu0 %v2707_v0 }
0x15fb   :  { %2593 = vmatpush3.bf16.msra.mxu0 %v2846_v37 }
0x16ba   :  { %v1577_v32 = vpop.f32.mrb[12].mxu1 }
0x16bb   :  { %v1578_v33 = vadd.f32 %v2878_v48, %v1577_v32  ;;  %v2399_v35 = vpop.f32.mrb[13].mxu1  ;;  %v1847_v32 = vld [vmem:[#allocation4] sm:$0xff] }
0x16bd   :  { %1588 = vrot.lane.b32.xlu1 %v1578_v33, %s2711_s2  ;;  %v2051_v30 = vmul.f32 -1.442695, %v1578_v33 }
0x16bf   :  { %2688 = vpow2.f32 %v2051_v30  ;;  %v1850_v30 = vld [vmem:[#allocation4 + $0x18] sm:$0xff] }
0x16c1   :  { %v1686_v28 = vpop.f32.mrb[14].mxu0 }
0x16c2   :  { %v1697_v4 = vadd.f32 %v1686_v28, %v2800_v10  ;;  %v2410_v36 = vpop.f32.mrb[15].mxu0  ;;  %v1690_v0 = vadd.f32 %v2052_v34, %v1686_v28 }
0x16c4   :  { %1699 = vrot.lane.b32.xlu1 %v1697_v4, %s2710_s15  ;;  %v2054_v37 = vmul.f32 -1.442695, %v1690_v0  ;;  %v1849_v4 = vld [vmem:[#allocation4 + $0x10] sm:$0xff]  ;;  %v1851_v0 = vld [vmem:[#allocation4 + $0x20] sm:$0xff] }
0x16c6   :  { %2690 = vpow2.f32 %v2054_v37 }
0x16c9   :  { %v2689_v38 = vpop.eup %2688 }
0x16ca   :  { %v1584_v48 = vadd.f32 1.0, %v2689_v38  ;;  %v1852_v38 = vld [vmem:[#allocation4 + $0x28] sm:$0xff] }
0x16cc   :  { %2692 = vrcp.f32 %v1584_v48 }
0x16d0   :  { %v2691_v39 = vpop.eup %2690 }
0x16d1   :  { %v1694_v40 = vadd.f32 1.0, %v2691_v39 }
0x16d3   :  { %2694 = vrcp.f32 %v1694_v40 }
0x16d6   :  { %v2693_v41 = vpop.eup %2692 }
0x16d7   :  { %v1598_v51 = vsub.f32 1.0, %v2693_v41  ;;  %v1604_v53 = vmul.f32 %v2693_v41, %v1505_v27 }
0x16dd   :  { %v2695_v43 = vpop.eup %2694 }
0x16de   :  { %v1709_v58 = vsub.f32 1.0, %v2695_v43 }
0x172f   :  { %v1589_v10 = vpop.permute.xlu1 %1588 }
0x1730   :  { %v1591_v42 = vmul.f32 %v2693_v41, %v1589_v10 }
0x1732   :  { %1593 = vrot.lane.b32.xlu0 %v1591_v42, %s2710_s15 }
0x1736   :  { %v1700_v44 = vpop.permute.xlu1 %1699 }
0x1737   :  { %v1702_v45 = vmul.f32 %v2695_v43, %v1700_v44 }
0x1739   :  { %1704 = vrot.lane.b32.xlu0 %v1702_v45, %s2710_s15  ;;  %v2057_v45 = vld [vmem:[%s3203_s7] ss:$0 sm:$0xff] }
0x17a4   :  { %v1594_v46 = vpop.permute.xlu0 %1593 }
0x17a5   :  { %v1596_v5 = vadd.f32 %v1594_v46, %v1578_v33  ;;  %v1848_v33 = vld [vmem:[#allocation4 + $0x8] sm:$0xff] }
0x17a7   :  { %2696 = vtanh.f32 %v1596_v5 }
0x17ab   :  { %v1705_v8 = vpop.permute.xlu0 %1704 }
0x17ac   :  { %v1707_v47 = vadd.f32 %v2052_v34, %v1705_v8 }
0x17ae   :  { %2698 = vtanh.f32 %v1707_v47 }
0x17b1   :  { %v2697_v49 = vpop.eup %2696 }
0x17b2   :  { %1600 = vrot.lane.b32.xlu1 %v2697_v49, %s2712_s29 }
0x17b8   :  { %v2699_v50 = vpop.eup %2698 }
0x17b9   :  { %1711 = vrot.lane.b32.xlu1 %v2699_v50, %s2712_s29 }
0x1824   :  { %v1601_v52 = vpop.permute.xlu1 %1600 }
0x1825   :  { %v1603_v54 = vmul.f32 %v1601_v52, %v1598_v51 }
0x1827   :  { %v1605_v55 = vadd.f32 %v1604_v53, %v1603_v54 }
0x1829   :  { %1607 = vrot.lane.b32.xlu0 %v1605_v55, %s2712_s29 }
0x182b   :  { %v1712_v57 = vpop.permute.xlu1 %1711 }
0x182c   :  { %v1714_v60 = vmul.f32 %v1712_v57, %v1709_v58 }
0x182d   :  { %1715 = vrot.lane.b32.xlu0 %v1613_v31, %s2711_s2 }
0x189b   :  { %v1608_v56 = vpop.permute.xlu0 %1607 }
0x189c   :  { %1610 = vst.msk [vmem:[#allocation3] sm:$0xff] %vm43_vm0, %v1608_v56  ;;  %1612 = vst.msk [vmem:[#allocation4 + $0x30] sm:$0xff] %vm43_vm0, %v1608_v56 }
0x189f   :  { %v1716_v59 = vpop.permute.xlu0 %1715 }
0x18a0   :  { %v1718_v61 = vmul.f32 %v2695_v43, %v1716_v59 }
0x18a2   :  { %v1719_v62 = vadd.f32 %v1718_v61, %v1714_v60 }
0x18a3   :  { %v1614_v63 = vld [vmem:[#allocation3] sm:$0xff]  ;;  %v1853_v39 = vld [vmem:[#allocation4 + $0x30] sm:$0xff] }
0x18a4   :  { %1726 = vrot.lane.b32.xlu0 %v1614_v63, %s2711_s2  ;;  %1721 = vrot.lane.b32.xlu1 %v1719_v62, %s2712_s29 }
0x1916   :  { %v1722_v1 = vpop.permute.xlu1 %1721  ;;  %v3112_v2 = vpop.permute.xlu0 %1726 }
0x1917   :  { %1724 = vst.msk [vmem:[#allocation2] sm:$0xff] %vm43_vm0, %v1722_v1  ;;  %v1729_v3 = vsel %vm43_vm0, %v1722_v1, %v3112_v2 }
0x1918   :  { %2428 = vmatmul.mubr.msk.f32.vlgmr.msra.gmra.mrb[16].mxu0 %vm176_vm2, %v1729_v3 }
0x19eb   :  { %v1799_v7 = vpop.f32.mrb[16].mxu0 }
0x19ec   :  { %v1800_v11 = vadd.f32 %v2706_v9, %v1799_v7  ;;  %v2429_v12 = vpop.f32.mrb[17].mxu0 }
0x19ee   :  { %1810 = vrot.lane.b32.xlu1 %v1800_v11, %s2711_s2  ;;  %v2056_v13 = vmul.f32 -1.442695, %v1800_v11 }
0x19f0   :  { %2700 = vpow2.f32 %v2056_v13 }
0x19fa   :  { %v2701_v14 = vpop.eup %2700 }
0x19fb   :  { %v1806_v15 = vadd.f32 1.0, %v2701_v14 }
0x19fd   :  { %2702 = vrcp.f32 %v1806_v15 }
0x1a07   :  { %v2703_v19 = vpop.eup %2702 }
0x1a08   :  { %v1820_v41 = vsub.f32 1.0, %v2703_v19  ;;  %v1826_v42 = vmul.f32 %v2703_v19, %v3112_v2 }
0x1a60   :  { %v1811_v20 = vpop.permute.xlu1 %1810 }
0x1a61   :  { %v1813_v21 = vmul.f32 %v2703_v19, %v1811_v20 }
0x1a63   :  { %1815 = vrot.lane.b32.xlu0 %v1813_v21, %s2710_s15 }
0x1a67   :  { %1837 = vperm.xlu0 %2609, %v1835_v24  }
0x1ad5   :  { %v1816_v26 = vpop.permute.xlu0 %1815 }
0x1ad6   :  { %v1818_v27 = vadd.f32 %v1816_v26, %v1800_v11 }
0x1ad8   :  { %2704 = vtanh.f32 %v1818_v27 }
0x1ae2   :  { %v2705_v29 = vpop.eup %2704 }
0x1ae3   :  { %1822 = vrot.lane.b32.xlu1 %v2705_v29, %s2712_s29 }
0x1ae6   :  { %v3139_v31 = vpop.permute.xlu0 %1837 }
0x1ae7   :  { %vm1839_vm3 = vcmp.gt.s32.totalorder %v3139_v31, 0  ;;  %vm1840_vm4 = vcmp.gt.s32.totalorder %v3139_v31, 1  ;;  %vm1841_vm5 = vcmp.gt.s32.totalorder %v3139_v31, 2  ;;  %vm1842_vm6 = vcmp.gt.s32.totalorder %v3139_v31, 3 }
0x1ae8   :  { %v1855_v35 = vsel %vm1839_vm3, %v1847_v32, 0.0  ;;  %v1856_v28 = vsel %vm1840_vm4, %v1848_v33, 0.0  ;;  %v1857_v36 = vsel %vm1841_vm5, %v1849_v4, 0.0  ;;  %vm1843_vm7 = vcmp.gt.s32.totalorder %v3139_v31, 4 }
0x1ae9   :  { %2438 = vmatprep.mubr.msk.f32.mxu1 %vm43_vm0, %v1855_v35  ;;  %v1858_v34 = vsel %vm1842_vm6, %v1850_v30, 0.0  ;;  %v1859_v37 = vsel %vm1843_vm7, %v1851_v0, 0.0  ;;  %vm1844_vm8 = vcmp.gt.s32.totalorder %v3139_v31, 5  ;;  %vm1845_vm9 = vcmp.gt.s32.totalorder %v3139_v31, 6 }
0x1aea   :  { %2439 = vmatmul.mubr.msk.f32.vlgmr.msra.gmra.mrb[14].mxu1 %vm43_vm0, %v1856_v28  ;;  %v1860_v48 = vsel %vm1844_vm8, %v1852_v38, 0.0  ;;  %v1861_v40 = vsel %vm1845_vm9, %v1853_v39, 0.0  ;;  %vm1846_vm11 = vcmp.gt.s32.totalorder %v3139_v31, 7 }
0x1aeb   :  { %2441 = vmatprep.mubr.msk.f32.mxu1 %vm43_vm0, %v1857_v36 }
0x1aee   :  { %2442 = vmatmul.mubr.msk.f32.gmra.mrb[16].mxu1 %vm43_vm0, %v1858_v34 }
0x1aef   :  { %2444 = vmatprep.mubr.msk.f32.mxu1 %vm43_vm0, %v1859_v37 }
0x1af2   :  { %2445 = vmatmul.mubr.msk.f32.gmra.mrb[18].mxu1 %vm43_vm0, %v1860_v48 }
0x1af3   :  { %2447 = vmatprep.mubr.msk.f32.mxu1 %vm43_vm0, %v1861_v40 }
0x1b55   :  { %v1823_v10 = vpop.permute.xlu1 %1822 }
0x1b56   :  { %v1825_v43 = vmul.f32 %v1823_v10, %v1820_v41 }
0x1b58   :  { %v1827_v44 = vadd.f32 %v1826_v42, %v1825_v43 }
0x1b5a   :  { %1829 = vrot.lane.b32.xlu1 %v1827_v44, %s2712_s29 }
0x1bbd   :  { %v2440_v46 = vpop.f32.mrb[14].mxu1 }
0x1bbe   :  { %v1970_v5 = vadd.f32 %v2440_v46, %v2057_v45  ;;  %v1964_v8 = vpop.f32.mrb[15].mxu1 }
0x1bbf   :  { %v1965_v47 = vadd.f32 %v2057_v45, %v1964_v8 }
0x1bc0   :  { %2005 = vst.msk [vmem:[%s3204_s8 + $0x8] sm:$0xff] %vm2003_vm10, %v1970_v5 }
0x1bc1   :  { %2004 = vst.msk [vmem:[%s3204_s8] sm:$0xff] %vm2003_vm10, %v1965_v47  ;;  %v2443_v49 = vpop.f32.mrb[16].mxu1 }
0x1bc2   :  { %v1980_v50 = vadd.f32 %v2443_v49, %v2057_v45  ;;  %v1974_v51 = vpop.f32.mrb[17].mxu1 }
0x1bc3   :  { %v1975_v52 = vadd.f32 %v2057_v45, %v1974_v51 }
0x1bc4   :  { %2007 = vst.msk [vmem:[%s3204_s8 + $0x18] sm:$0xff] %vm2003_vm10, %v1980_v50 }
0x1bc5   :  { %2006 = vst.msk [vmem:[%s3204_s8 + $0x10] sm:$0xff] %vm2003_vm10, %v1975_v52  ;;  %v2446_v53 = vpop.f32.mrb[18].mxu1 }
0x1bc6   :  { %v1990_v54 = vadd.f32 %v2446_v53, %v2057_v45  ;;  %v1984_v55 = vpop.f32.mrb[19].mxu1 }
0x1bc7   :  { %v1985_v56 = vadd.f32 %v2057_v45, %v1984_v55 }
0x1bc8   :  { %2009 = vst.msk [vmem:[%s3204_s8 + $0x28] sm:$0xff] %vm2003_vm10, %v1990_v54 }
0x1bc9   :  { %2008 = vst.msk [vmem:[%s3204_s8 + $0x20] sm:$0xff] %vm2003_vm10, %v1985_v56 }
0x1bcc   :  { %v1830_v57 = vpop.permute.xlu1 %1829 }
0x1bcd   :  { %1832 = vst.msk [vmem:[#allocation3] sm:$0xff] %vm43_vm0, %v1830_v57  ;;  %1834 = vst.msk [vmem:[#allocation4 + $0x38] sm:$0xff] %vm43_vm0, %v1830_v57 }
0x1bd4   :  { %v1854_v58 = vld [vmem:[#allocation4 + $0x38] sm:$0xff] }
0x1bd5   :  { %v1862_v59 = vsel %vm1846_vm11, %v1854_v58, 0.0 }
0x1bd6   :  { %2448 = vmatmul.mubr.msk.f32.gmra.mrb[20].mxu1 %vm43_vm0, %v1862_v59 }
0x1ca9   :  { %v2449_v60 = vpop.f32.mrb[20].mxu1 }
0x1caa   :  { %v2000_v61 = vadd.f32 %v2449_v60, %v2057_v45  ;;  %v1994_v62 = vpop.f32.mrb[21].mxu1 }
0x1cab   :  { %v1995_v63 = vadd.f32 %v2057_v45, %v1994_v62 }
0x1cac   :  { %2011 = vst.msk [vmem:[%s3204_s8 + $0x38] sm:$0xff] %vm2003_vm10, %v2000_v61 }
0x1cad   :  { %2010 = vst.msk [vmem:[%s3204_s8 + $0x30] sm:$0xff] %vm2003_vm10, %v1995_v63 }

</bundles_post_ra>
